<compile_context>
chip_gen: v7x
topology: tpu7x:2x2x1
jax: 0.10.0
libtpu: 0.0.40
codegen_flags: <defaults>
</compile_context>

<pallas_src>
import jax
import jax.numpy as jnp
from jax import lax
from jax.experimental import pallas as pl
from jax.experimental.pallas import tpu as pltpu


# --------------------------------------------------------------------------
# Phase 1: fused (upsample + 3x3 conv, no bias) + per-tile BN partial stats
# --------------------------------------------------------------------------
def _upconv_stats_kernel(x_ref, w_ref, conv_ref, stats_ref):
    """One (batch, source-row-tile) block.

    x_ref:     (1, H+2, W+2, Cin)    zero-ringed ORIGINAL-resolution image (f32)
    w_ref:     (3, 3*Cin, 4*Cout)    folded weights, per row tap dh; columns
                                     ordered (q_row_parity, p_col_parity, Cout)
    conv_ref:  (1, TH, W*4*Cout)     conv output tile (pre bias/BN), lane order
                                     per row = (jc, q, p, Cout)
    stats_ref: (1, 1, 1, 8*Cout)     per-tile [sum | sum-of-squares] over (q,p,Cout)
    """
    _, th, _ = conv_ref.shape
    cin = x_ref.shape[-1]
    wp = x_ref.shape[2]                      # W + 2
    W = wp - 2
    c4 = w_ref.shape[-1]                     # 4 * Cout

    t = pl.program_id(1)
    row0 = pl.multiple_of(t * th, th)
    # Source rows needed by this tile (padded coords): [t*th, t*th + th + 2)
    src = x_ref[0, pl.ds(row0, th + 2), :, :]            # (th+2, W+2, Cin)

    # 3 accumulated matmuls, one per folded row tap dh.
    y = jnp.zeros((th * W, c4), jnp.float32)
    for dh in range(3):
        rows = src[dh:dh + th, :, :]                      # (th, W+2, Cin)
        slab = jnp.concatenate(
            [rows[:, dw:dw + W, :] for dw in range(3)], axis=-1)   # (th, W, 3*Cin)
        y = y + jnp.dot(slab.reshape(th * W, 3 * cin), w_ref[dh],
                        preferred_element_type=jnp.float32)

    # BatchNorm partial statistics (taken from the natural matmul layout).
    s1 = jnp.sum(y, axis=0, keepdims=True)                # (1, 4*Cout)
    s2 = jnp.sum(y * y, axis=0, keepdims=True)
    stats_ref[...] = jnp.concatenate([s1, s2], axis=-1).reshape(1, 1, 1, 2 * c4)

    # Interleave rows (ic, jc) x cols (q,p,co) -> (ic, [jc, q, p, co]) so the HBM
    # store is a full-lane (W*4*Cout wide) write.  Built from sublane slices plus a
    # single lane concat, which lower cleanly.
    y3 = y.reshape(th, W, c4)
    tile_val = jnp.concatenate([y3[:, j, :] for j in range(W)], axis=-1)  # (th, W*4*Cout)
    conv_ref[0] = tile_val


# --------------------------------------------------------------------------
# VMEM-aware tile-height chooser (tile height is in SOURCE rows)
# --------------------------------------------------------------------------
def _vmem_capacity_bytes():
    try:
        info = pltpu.get_tpu_info()
        cap = getattr(info, "vmem_capacity_bytes", None)
        if cap:
            return int(cap)
    except Exception:
        pass
    return 64 * 1024 * 1024          # conservative fallback (v7x physical)


def _choose_tile_h(H, W, Cin, Cout, budget, want_row_split):
    def r8(n):
        return ((n + 7) // 8) * 8

    def r128(n):
        return ((n + 127) // 128) * 128

    c4 = 4 * Cout
    lane_out = W * c4

    def cost(th):
        # pipelined (double-buffered) blocks
        x_blk = (H + 2) * r8(W + 2) * r128(Cin) * 4
        w_blk = 3 * r8(3 * Cin) * r128(c4) * 4
        conv_blk = r8(th) * r128(lane_out) * 4
        stats_blk = 8 * r128(2 * c4) * 4
        # in-kernel temporaries (src copy, per-dh slab, f32 accumulator, interleave)
        src_tmp = (th + 2) * r8(W + 2) * r128(Cin) * 4
        slab_tmp = r8(th * W) * r128(3 * Cin) * 4
        acc_tmp = r8(th * W) * r128(c4) * 4
        inter_tmp = r8(th) * r128(lane_out) * 4
        return (2 * (x_blk + w_blk + conv_blk + stats_blk)
                + src_tmp + slab_tmp + acc_tmp + inter_tmp)

    # block second-to-last dim must be a multiple of 8 or equal the full dim
    legal = [th for th in range(H, 0, -1)
             if H % th == 0 and (th % 8 == 0 or th == H)]
    fitting = [th for th in legal if cost(th) <= budget]
    if not fitting:
        # TODO(synk): halo-DMA the source rows manually for very large shapes.
        return legal[-1]
    if want_row_split:
        smaller = [th for th in fitting if th < H]
        if smaller:
            return smaller[0]
    return fitting[0]


# --------------------------------------------------------------------------
# Public forward: NCHW in, NCHW out (matches the PyTorch module interface)
# --------------------------------------------------------------------------
def up_conv_forward(x_nchw, w_hwio, bias, gamma, beta, *, eps=1e-5):
    N, Cin, H, W = x_nchw.shape
    Cout = w_hwio.shape[-1]
    H2, W2 = 2 * H, 2 * W
    c4 = 4 * Cout

    # ---- original-resolution NHWC image with a single zero ring -------------
    x = jnp.transpose(x_nchw, (0, 2, 3, 1)).astype(jnp.float32)
    xp = jnp.pad(x, ((0, 0), (1, 1), (1, 1), (0, 0)))                # (N,H+2,W+2,Cin)

    # ---- fold BOTH row and column parity of the x2 upsample into the weights
    #   A[q, dh, a]: original row tap a contributes to folded row offset dh for
    #   output-row parity q (and identically for columns).
    A = jnp.array([[[1., 0., 0.], [0., 1., 1.], [0., 0., 0.]],
                   [[0., 0., 0.], [1., 1., 0.], [0., 0., 1.]]], dtype=jnp.float32)
    wk = jnp.einsum("qha,pvb,abio->hviqpo", A, A, w_hwio.astype(jnp.float32))
    wk = wk.reshape(3, 3 * Cin, c4)            # per-dh (dw,ci) x (q,p,co)

    # ---- VMEM-aware tiling ---------------------------------------------------
    vmem_cap = _vmem_capacity_bytes()
    vmem_limit = int(min(max(32 * 1024 * 1024, vmem_cap // 2), 100 * 1024 * 1024))
    tile_h = _choose_tile_h(H, W, Cin, Cout,
                            budget=int(0.4 * vmem_limit),
                            want_row_split=(N < 2))
    n_t = H // tile_h
    grid = (N, n_t)

    cparams = pltpu.CompilerParams(
        dimension_semantics=("parallel", "parallel"),
        vmem_limit_bytes=vmem_limit,
    )

    # ---- phase 1: conv (upsample fused into weights) + partial BN stats ------
    conv_i, stats = pl.pallas_call(
        _upconv_stats_kernel,
        grid=grid,
        in_specs=[
            pl.BlockSpec((1, H + 2, W + 2, Cin), lambda n, t: (n, 0, 0, 0)),
            pl.BlockSpec((3, 3 * Cin, c4), lambda n, t: (0, 0, 0)),
        ],
        out_specs=[
            pl.BlockSpec((1, tile_h, W * c4), lambda n, t: (n, t, 0)),
            pl.BlockSpec((1, 1, 1, 2 * c4), lambda n, t: (n, t, 0, 0)),
        ],
        out_shape=(
            jax.ShapeDtypeStruct((N, H, W * c4), jnp.float32),
            jax.ShapeDtypeStruct((N, n_t, 1, 2 * c4), jnp.float32),
        ),
        compiler_params=cparams,
    )(xp, wk)

    # ---- global batch statistics + folding of (conv bias, gamma, beta) -------
    M = N * H2 * W2
    s = stats[..., :c4].sum(axis=(0, 1, 2)).reshape(2, 2, Cout).sum(axis=(0, 1))
    ss = stats[..., c4:].sum(axis=(0, 1, 2)).reshape(2, 2, Cout).sum(axis=(0, 1))
    mean_c = s / M                                    # mean of conv (pre-bias)
    var = jnp.maximum(ss / M - mean_c * mean_c, 0.0)  # biased var (bias-invariant)
    inv_std = lax.rsqrt(var + eps)
    scale = gamma.astype(jnp.float32) * inv_std
    shift = beta.astype(jnp.float32) - scale * mean_c  # conv bias cancels exactly

    # ---- epilogue: affine + ReLU fused by XLA with the layout transposes -----
    y = conv_i.reshape(N, H, W, 2, 2, Cout)            # (n, ic, jc, q, p, co)
    y = jnp.maximum(y * scale + shift, 0.0)
    y = jnp.transpose(y, (0, 1, 3, 2, 4, 5)).reshape(N, H2, W2, Cout)   # NHWC x2
    return jnp.transpose(y, (0, 3, 1, 2)).astype(x_nchw.dtype)           # NCHW


# --------------------------------------------------------------------------
# Plain-JAX reference of the PyTorch module (forward, training-mode BN)
# --------------------------------------------------------------------------
def _reference(x_nchw, w_hwio, bias, gamma, beta, eps=1e-5):
    x = jnp.transpose(x_nchw, (0, 2, 3, 1))
    x = jnp.repeat(jnp.repeat(x, 2, axis=1), 2, axis=2)              # nearest x2
    y = lax.conv_general_dilated(
        x, w_hwio, window_strides=(1, 1), padding=((1, 1), (1, 1)),
        dimension_numbers=("NHWC", "HWIO", "NHWC"),
        precision=lax.Precision.HIGHEST) + bias
    mean = jnp.mean(y, axis=(0, 1, 2))
    var = jnp.mean((y - mean) ** 2, axis=(0, 1, 2))
    y = (y - mean) * lax.rsqrt(var + eps) * gamma + beta
    y = jnp.maximum(y, 0.0)
    return jnp.transpose(y, (0, 3, 1, 2))


if __name__ == "__main__":
    key = jax.random.PRNGKey(0)
    kx, kw, kb = jax.random.split(key, 3)

    # up_conv(ch_in=4, ch_out=8) on x: (N=2, Cin=4, H=16, W=16)
    N, Cin, Cout, H, W = 2, 4, 8, 16, 16

    x = jax.random.normal(kx, (N, Cin, H, W), dtype=jnp.float32)
    w_hwio = 0.1 * jax.random.normal(kw, (3, 3, Cin, Cout), dtype=jnp.float32)
    bias = 0.1 * jax.random.normal(kb, (Cout,), dtype=jnp.float32)
    gamma = 1.0 + 0.1 * jnp.arange(Cout, dtype=jnp.float32)   # BN weight
    beta = 0.05 * jnp.arange(Cout, dtype=jnp.float32)         # BN bias

    fwd = jax.jit(up_conv_forward)
    out = fwd(x, w_hwio, bias, gamma, beta)
    out = jax.block_until_ready(out)
    assert out.shape == (N, Cout, 2 * H, 2 * W)

    # numerical sanity check against the plain-JAX reference of the module
    ref = _reference(x, w_hwio, bias, gamma, beta)
    max_err = float(jnp.max(jnp.abs(out - ref)))
    assert jnp.allclose(out, ref, atol=2e-3, rtol=2e-3), f"max abs err {max_err}"

    print("KERNEL_OK")
</pallas_src>

<mosaic_0001>
module attributes {stable_mosaic.version = 11 : i64} {
  func.func @_upconv_stats_kernel(%arg0: i32, %arg1: i32, %arg2: memref<1x18x18x4xf32, #tpu.memory_space<vmem>>, %arg3: memref<3x12x32xf32, #tpu.memory_space<vmem>>, %arg4: memref<1x16x512xf32, #tpu.memory_space<vmem>>, %arg5: memref<1x1x1x64xf32, #tpu.memory_space<vmem>>) attributes {dimension_semantics = [#tpu.dimension_semantics<parallel>, #tpu.dimension_semantics<parallel>], iteration_bounds = array<i64: 2, 1>, scalar_prefetch = 0 : i64, scratch_operands = 0 : i64, tpu.core_type = #tpu.core_type<tc>, window_params = [{transform_indices = @transform_0, window_bounds = array<i64: 1, 18, 18, 4>}, {pipeline_mode = #tpu.pipeline_mode<synchronous>, transform_indices = @transform_1, window_bounds = array<i64: 3, 12, 32>}, {transform_indices = @transform_2, window_bounds = array<i64: 1, 16, 512>}, {transform_indices = @transform_3, window_bounds = array<i64: 1, 1, 1, 64>}]} {
    %c16_i32 = arith.constant 16 : i32
    %0 = arith.muli %arg1, %c16_i32 : i32
    %1 = tpu.assume_multiple %0, 16 : i32
    %c0 = arith.constant 0 : index
    %2 = arith.index_cast %1 : i32 to index
    %c0_0 = arith.constant 0 : index
    %c0_1 = arith.constant 0 : index
    %3 = vector.load %arg2[%c0, %2, %c0_0, %c0_1] : memref<1x18x18x4xf32, #tpu.memory_space<vmem>>, vector<1x18x18x4xf32>
    %4 = vector.shape_cast %3 : vector<1x18x18x4xf32> to vector<18x18x4xf32>
    %cst = arith.constant 0.000000e+00 : f32
    %5 = vector.broadcast %cst : f32 to vector<256x32xf32>
    %6 = vector.extract_strided_slice %4 {offsets = [0, 0, 0], sizes = [16, 18, 4], strides = [1, 1, 1]} : vector<18x18x4xf32> to vector<16x18x4xf32>
    %7 = vector.extract_strided_slice %6 {offsets = [0, 0, 0], sizes = [16, 16, 4], strides = [1, 1, 1]} : vector<16x18x4xf32> to vector<16x16x4xf32>
    %8 = vector.extract_strided_slice %6 {offsets = [0, 1, 0], sizes = [16, 16, 4], strides = [1, 1, 1]} : vector<16x18x4xf32> to vector<16x16x4xf32>
    %9 = vector.extract_strided_slice %6 {offsets = [0, 2, 0], sizes = [16, 16, 4], strides = [1, 1, 1]} : vector<16x18x4xf32> to vector<16x16x4xf32>
    %10 = tpu.concatenate %7, %8, %9 in 2 : vector<16x16x4xf32>, vector<16x16x4xf32>, vector<16x16x4xf32> -> vector<16x16x12xf32>
    %11 = vector.shape_cast %10 : vector<16x16x12xf32> to vector<256x12xf32>
    %c0_2 = arith.constant 0 : index
    %c0_3 = arith.constant 0 : index
    %c0_4 = arith.constant 0 : index
    %12 = vector.load %arg3[%c0_2, %c0_3, %c0_4] : memref<3x12x32xf32, #tpu.memory_space<vmem>>, vector<1x12x32xf32>
    %13 = vector.shape_cast %12 : vector<1x12x32xf32> to vector<12x32xf32>
    %cst_5 = arith.constant dense<0.000000e+00> : vector<256x32xf32>
    %14 = tpu.matmul %11, %13, %cst_5 {dimension_numbers = #tpu.dot_dimension_numbers<[1], [0], [0], [1], [0, 0, 1, 1], [], []>} : vector<256x12xf32>, vector<12x32xf32>, vector<256x32xf32> -> vector<256x32xf32>
    %15 = arith.addf %5, %14 : vector<256x32xf32>
    %16 = vector.extract_strided_slice %4 {offsets = [1, 0, 0], sizes = [16, 18, 4], strides = [1, 1, 1]} : vector<18x18x4xf32> to vector<16x18x4xf32>
    %17 = vector.extract_strided_slice %16 {offsets = [0, 0, 0], sizes = [16, 16, 4], strides = [1, 1, 1]} : vector<16x18x4xf32> to vector<16x16x4xf32>
    %18 = vector.extract_strided_slice %16 {offsets = [0, 1, 0], sizes = [16, 16, 4], strides = [1, 1, 1]} : vector<16x18x4xf32> to vector<16x16x4xf32>
    %19 = vector.extract_strided_slice %16 {offsets = [0, 2, 0], sizes = [16, 16, 4], strides = [1, 1, 1]} : vector<16x18x4xf32> to vector<16x16x4xf32>
    %20 = tpu.concatenate %17, %18, %19 in 2 : vector<16x16x4xf32>, vector<16x16x4xf32>, vector<16x16x4xf32> -> vector<16x16x12xf32>
    %21 = vector.shape_cast %20 : vector<16x16x12xf32> to vector<256x12xf32>
    %c1 = arith.constant 1 : index
    %c0_6 = arith.constant 0 : index
    %c0_7 = arith.constant 0 : index
    %22 = vector.load %arg3[%c1, %c0_6, %c0_7] : memref<3x12x32xf32, #tpu.memory_space<vmem>>, vector<1x12x32xf32>
    %23 = vector.shape_cast %22 : vector<1x12x32xf32> to vector<12x32xf32>
    %cst_8 = arith.constant dense<0.000000e+00> : vector<256x32xf32>
    %24 = tpu.matmul %21, %23, %cst_8 {dimension_numbers = #tpu.dot_dimension_numbers<[1], [0], [0], [1], [0, 0, 1, 1], [], []>} : vector<256x12xf32>, vector<12x32xf32>, vector<256x32xf32> -> vector<256x32xf32>
    %25 = arith.addf %15, %24 : vector<256x32xf32>
    %26 = vector.extract_strided_slice %4 {offsets = [2, 0, 0], sizes = [16, 18, 4], strides = [1, 1, 1]} : vector<18x18x4xf32> to vector<16x18x4xf32>
    %27 = vector.extract_strided_slice %26 {offsets = [0, 0, 0], sizes = [16, 16, 4], strides = [1, 1, 1]} : vector<16x18x4xf32> to vector<16x16x4xf32>
    %28 = vector.extract_strided_slice %26 {offsets = [0, 1, 0], sizes = [16, 16, 4], strides = [1, 1, 1]} : vector<16x18x4xf32> to vector<16x16x4xf32>
    %29 = vector.extract_strided_slice %26 {offsets = [0, 2, 0], sizes = [16, 16, 4], strides = [1, 1, 1]} : vector<16x18x4xf32> to vector<16x16x4xf32>
    %30 = tpu.concatenate %27, %28, %29 in 2 : vector<16x16x4xf32>, vector<16x16x4xf32>, vector<16x16x4xf32> -> vector<16x16x12xf32>
    %31 = vector.shape_cast %30 : vector<16x16x12xf32> to vector<256x12xf32>
    %c2 = arith.constant 2 : index
    %c0_9 = arith.constant 0 : index
    %c0_10 = arith.constant 0 : index
    %32 = vector.load %arg3[%c2, %c0_9, %c0_10] : memref<3x12x32xf32, #tpu.memory_space<vmem>>, vector<1x12x32xf32>
    %33 = vector.shape_cast %32 : vector<1x12x32xf32> to vector<12x32xf32>
    %cst_11 = arith.constant dense<0.000000e+00> : vector<256x32xf32>
    %34 = tpu.matmul %31, %33, %cst_11 {dimension_numbers = #tpu.dot_dimension_numbers<[1], [0], [0], [1], [0, 0, 1, 1], [], []>} : vector<256x12xf32>, vector<12x32xf32>, vector<256x32xf32> -> vector<256x32xf32>
    %35 = arith.addf %25, %34 : vector<256x32xf32>
    %cst_12 = arith.constant dense<0.000000e+00> : vector<32xf32>
    %36 = vector.multi_reduction <add>, %35, %cst_12 [0] : vector<256x32xf32> to vector<32xf32>
    %37 = vector.shape_cast %36 : vector<32xf32> to vector<1x32xf32>
    %38 = arith.mulf %35, %35 : vector<256x32xf32>
    %cst_13 = arith.constant dense<0.000000e+00> : vector<32xf32>
    %39 = vector.multi_reduction <add>, %38, %cst_13 [0] : vector<256x32xf32> to vector<32xf32>
    %40 = vector.shape_cast %39 : vector<32xf32> to vector<1x32xf32>
    %41 = tpu.concatenate %37, %40 in 1 : vector<1x32xf32>, vector<1x32xf32> -> vector<1x64xf32>
    %42 = vector.shape_cast %41 : vector<1x64xf32> to vector<1x1x1x64xf32>
    %c0_14 = arith.constant 0 : index
    %c0_15 = arith.constant 0 : index
    %c0_16 = arith.constant 0 : index
    %c0_17 = arith.constant 0 : index
    %43 = vector.load %arg5[%c0_14, %c0_15, %c0_16, %c0_17] : memref<1x1x1x64xf32, #tpu.memory_space<vmem>>, vector<1x1x1x64xf32>
    tpu.vector_store %arg5[%c0_14, %c0_15, %c0_16, %c0_17], %42 {strides = array<i32>} : memref<1x1x1x64xf32, #tpu.memory_space<vmem>>, vector<1x1x1x64xf32>,
    %44 = vector.shape_cast %35 : vector<256x32xf32> to vector<16x16x32xf32>
    %45 = vector.extract_strided_slice %44 {offsets = [0, 0, 0], sizes = [16, 1, 32], strides = [1, 1, 1]} : vector<16x16x32xf32> to vector<16x1x32xf32>
    %46 = vector.shape_cast %45 : vector<16x1x32xf32> to vector<16x32xf32>
    %47 = vector.extract_strided_slice %44 {offsets = [0, 1, 0], sizes = [16, 1, 32], strides = [1, 1, 1]} : vector<16x16x32xf32> to vector<16x1x32xf32>
    %48 = vector.shape_cast %47 : vector<16x1x32xf32> to vector<16x32xf32>
    %49 = vector.extract_strided_slice %44 {offsets = [0, 2, 0], sizes = [16, 1, 32], strides = [1, 1, 1]} : vector<16x16x32xf32> to vector<16x1x32xf32>
    %50 = vector.shape_cast %49 : vector<16x1x32xf32> to vector<16x32xf32>
    %51 = vector.extract_strided_slice %44 {offsets = [0, 3, 0], sizes = [16, 1, 32], strides = [1, 1, 1]} : vector<16x16x32xf32> to vector<16x1x32xf32>
    %52 = vector.shape_cast %51 : vector<16x1x32xf32> to vector<16x32xf32>
    %53 = vector.extract_strided_slice %44 {offsets = [0, 4, 0], sizes = [16, 1, 32], strides = [1, 1, 1]} : vector<16x16x32xf32> to vector<16x1x32xf32>
    %54 = vector.shape_cast %53 : vector<16x1x32xf32> to vector<16x32xf32>
    %55 = vector.extract_strided_slice %44 {offsets = [0, 5, 0], sizes = [16, 1, 32], strides = [1, 1, 1]} : vector<16x16x32xf32> to vector<16x1x32xf32>
    %56 = vector.shape_cast %55 : vector<16x1x32xf32> to vector<16x32xf32>
    %57 = vector.extract_strided_slice %44 {offsets = [0, 6, 0], sizes = [16, 1, 32], strides = [1, 1, 1]} : vector<16x16x32xf32> to vector<16x1x32xf32>
    %58 = vector.shape_cast %57 : vector<16x1x32xf32> to vector<16x32xf32>
    %59 = vector.extract_strided_slice %44 {offsets = [0, 7, 0], sizes = [16, 1, 32], strides = [1, 1, 1]} : vector<16x16x32xf32> to vector<16x1x32xf32>
    %60 = vector.shape_cast %59 : vector<16x1x32xf32> to vector<16x32xf32>
    %61 = vector.extract_strided_slice %44 {offsets = [0, 8, 0], sizes = [16, 1, 32], strides = [1, 1, 1]} : vector<16x16x32xf32> to vector<16x1x32xf32>
    %62 = vector.shape_cast %61 : vector<16x1x32xf32> to vector<16x32xf32>
    %63 = vector.extract_strided_slice %44 {offsets = [0, 9, 0], sizes = [16, 1, 32], strides = [1, 1, 1]} : vector<16x16x32xf32> to vector<16x1x32xf32>
    %64 = vector.shape_cast %63 : vector<16x1x32xf32> to vector<16x32xf32>
    %65 = vector.extract_strided_slice %44 {offsets = [0, 10, 0], sizes = [16, 1, 32], strides = [1, 1, 1]} : vector<16x16x32xf32> to vector<16x1x32xf32>
    %66 = vector.shape_cast %65 : vector<16x1x32xf32> to vector<16x32xf32>
    %67 = vector.extract_strided_slice %44 {offsets = [0, 11, 0], sizes = [16, 1, 32], strides = [1, 1, 1]} : vector<16x16x32xf32> to vector<16x1x32xf32>
    %68 = vector.shape_cast %67 : vector<16x1x32xf32> to vector<16x32xf32>
    %69 = vector.extract_strided_slice %44 {offsets = [0, 12, 0], sizes = [16, 1, 32], strides = [1, 1, 1]} : vector<16x16x32xf32> to vector<16x1x32xf32>
    %70 = vector.shape_cast %69 : vector<16x1x32xf32> to vector<16x32xf32>
    %71 = vector.extract_strided_slice %44 {offsets = [0, 13, 0], sizes = [16, 1, 32], strides = [1, 1, 1]} : vector<16x16x32xf32> to vector<16x1x32xf32>
    %72 = vector.shape_cast %71 : vector<16x1x32xf32> to vector<16x32xf32>
    %73 = vector.extract_strided_slice %44 {offsets = [0, 14, 0], sizes = [16, 1, 32], strides = [1, 1, 1]} : vector<16x16x32xf32> to vector<16x1x32xf32>
    %74 = vector.shape_cast %73 : vector<16x1x32xf32> to vector<16x32xf32>
    %75 = vector.extract_strided_slice %44 {offsets = [0, 15, 0], sizes = [16, 1, 32], strides = [1, 1, 1]} : vector<16x16x32xf32> to vector<16x1x32xf32>
    %76 = vector.shape_cast %75 : vector<16x1x32xf32> to vector<16x32xf32>
    %77 = tpu.concatenate %46, %48, %50, %52, %54, %56, %58, %60, %62, %64, %66, %68, %70, %72, %74, %76 in 1 : vector<16x32xf32>, vector<16x32xf32>, vector<16x32xf32>, vector<16x32xf32>, vector<16x32xf32>, vector<16x32xf32>, vector<16x32xf32>, vector<16x32xf32>, vector<16x32xf32>, vector<16x32xf32>, vector<16x32xf32>, vector<16x32xf32>, vector<16x32xf32>, vector<16x32xf32>, vector<16x32xf32>, vector<16x32xf32> -> vector<16x512xf32>
    %c0_18 = arith.constant 0 : index
    %c0_19 = arith.constant 0 : index
    %c0_20 = arith.constant 0 : index
    %78 = vector.load %arg4[%c0_18, %c0_19, %c0_20] : memref<1x16x512xf32, #tpu.memory_space<vmem>>, vector<1x16x512xf32>
    %79 = vector.shape_cast %78 : vector<1x16x512xf32> to vector<16x512xf32>
    %80 = vector.shape_cast %77 : vector<16x512xf32> to vector<1x16x512xf32>
    tpu.vector_store %arg4[%c0_18, %c0_19, %c0_20], %80 {strides = array<i32>} : memref<1x16x512xf32, #tpu.memory_space<vmem>>, vector<1x16x512xf32>,
    return
  }
  func.func @transform_0(%arg0: i32, %arg1: i32) -> (i32, i32, i32, i32) {
    %c0_i32 = arith.constant 0 : i32
    %c0_i32_0 = arith.constant 0 : i32
    %c0_i32_1 = arith.constant 0 : i32
    %c0_i32_2 = arith.constant 0 : i32
    return %arg0, %c0_i32, %c0_i32_0, %c0_i32_1 : i32, i32, i32, i32
  }
  func.func @transform_1(%arg0: i32, %arg1: i32) -> (i32, i32, i32) {
    %c0_i32 = arith.constant 0 : i32
    %c0_i32_0 = arith.constant 0 : i32
    %c0_i32_1 = arith.constant 0 : i32
    %c0_i32_2 = arith.constant 0 : i32
    return %c0_i32, %c0_i32_0, %c0_i32_1 : i32, i32, i32
  }
  func.func @transform_2(%arg0: i32, %arg1: i32) -> (i32, i32, i32) {
    %c0_i32 = arith.constant 0 : i32
    %c0_i32_0 = arith.constant 0 : i32
    return %arg0, %arg1, %c0_i32 : i32, i32, i32
  }
  func.func @transform_3(%arg0: i32, %arg1: i32) -> (i32, i32, i32, i32) {
    %c0_i32 = arith.constant 0 : i32
    %c0_i32_0 = arith.constant 0 : i32
    %c0_i32_1 = arith.constant 0 : i32
    return %arg0, %arg1, %c0_i32, %c0_i32_0 : i32, i32, i32, i32
  }
}

</mosaic_0001>

<bundles_post_ra>
// kernel: up_conv_forward.1
= control target key start
LH: loop header
LB: loop body
LE: loop exit
PB: predicated region body
PF: predicated region fallthrough
CT: control target
= control target key end

     0   :  { %s3070_s12 = smov 0   ;;  %s3072_s13 = smov 0   ;;  %s4839_s0 = inlined_call_operand.vmem [shape: f32[2,18,18,4], index: 0, kind: input, shape index: {}]   ;;  %s4840_s1 = inlined_call_operand.vmem [shape: f32[3,12,32], index: 1, kind: input, shape index: {}]   ;;  %s4841_s2 = inlined_call_operand.vmem [shape: f32[2,16,512], index: 2, kind: output, shape index: {0}]   ;;  %s4842_s3 = inlined_call_operand.vmem [shape: f32[2,1,1,64], index: 3, kind: output, shape index: {1}]  }
   0x1   :  { %s3074_s14 = smov 0  }
   0x2 LB: > { %s26_s15 = sadd.s32 1, %s3038_s13  ;;  %p2537_p0 = scmp.ge.s32.totalorder %s3042_s14, 1  ;;  %s3042_s14 = sphi %s3074_s14, %s14_s14   ;;  %s3038_s13 = sphi %s3072_s13, %s4881_s13   ;;  %s3034_s12 = sphi %s3070_s12, %s4880_s12  }
   0x3   : > { %p28_p1 = scmp.ge.s32.totalorder %s26_s15, 2  ;;  %p156_p2 = scmp.lt.s32.totalorder %s3042_s14, 3 }
   0x5   : > { %s4883_s15 = smov (%p28_p1, %s26_s15), 0  ;;  %p157_p3 = pnand %p2537_p0, %p156_p2 }
   0x6   : > { %p191_p4 = scmp.lt.s32.totalorder (!%p157_p3), %s3034_s12, 1  ;;  %v2541_v0 = vld [vmem:[%s4840_s1 + $0x10] sm:$0xff] (!%p157_p3)  ;;  %v2542_v1 = vld [vmem:[%s4840_s1 + $0x18] sm:$0xf] (!%p157_p3)  ;;  %v738_v2 = vld [vmem:[%s4840_s1] sm:$0xff] (!%p157_p3)  ;;  %vm869_vm0 = vcmask (!%p157_p3), 1043456  }
   0x7   : > { %160 = sbr.rel (%p157_p3) target bundleno = 691 (0x2b3), region = 28  ;;  %v2905_v3 = vpack.c.bf16 (!%p157_p3), %v2542_v1, %v2541_v0  ;;  %v739_v4 = vld [vmem:[%s4840_s1 + $0x8] sm:$0xf] (!%p157_p3)  ;;  %vm3044_vm1 = vmmov (!%p157_p3), 1   ;;  %vm318_vm3 = vcmask (!%p157_p3), 1046528   ;;  %s3045_s28 = smov (!%p157_p3), 4  }
   0x8   : > { %vm3108_vm2 = vmpackc.low (!%p157_p3), %vm869_vm0, %vm3044_vm1  ;;  %v3112_v6 = vpack.c.bf16 (!%p157_p3), %v739_v4, %v738_v2  ;;  %vm495_vm4 = vcmask (!%p157_p3), 1045504   ;;  %s3046_s29 = smov (!%p157_p3), 8   ;;  %vm672_vm5 = vcmask (!%p157_p3), 31744   ;;  %vm705_vm6 = vcmask (!%p157_p3), 64512   ;;  %s3047_s7 = smov (!%p157_p3), 96  }
   0x9   : > { %2907 = vmatprep.subr.msk.bf16.mxu1 (!%p157_p3), %vm3108_vm2, %v2905_v3  ;;  %vm772_vm7 = vcmask (!%p157_p3), 97280   ;;  %vm1630_vm8 = vcmask (!%p157_p3), 261120   ;;  %vm1825_vm9 = vcmask (!%p157_p3), 1041409   ;;  %vm1828_vm10 = vcmask (!%p157_p3), 1042434   ;;  %s3048_s8 = smov (!%p157_p3), 32   ;;  %s3049_s9 = smov (!%p157_p3), 64  }
   0xa   : > { %2913 = vmatprep.subr.msk.bf16.mxu0 (!%p157_p3), %vm3108_vm2, %v3112_v6  ;;  %2910 = vmatpush3.bf16.msk.msra.mxu1 (!%p157_p3), %vm3108_vm2, %v2905_v3  ;;  %vm1831_vm11 = vcmask (!%p157_p3), 1043459   ;;  %vm1834_vm12 = vcmask (!%p157_p3), 1044484   ;;  %vm1837_vm13 = vcmask (!%p157_p3), 1045509   ;;  %vm1840_vm14 = vcmask (!%p157_p3), 1046534  }
   0xb   : > { %2916 = vmatpush3.bf16.msk.msra.mxu0 (!%p157_p3), %vm3108_vm2, %v3112_v6  ;;  %2923 = vmatprep.subr.msk.bf16.mxu1 (!%p157_p3), %vm3108_vm2, %v3112_v6  ;;  %vm1843_vm15 = vcmask (!%p157_p3), 1047559   ;;  %vm2377_vm0 = vcmask (!%p157_p3), 523264   ;;  %vm2380_vm1 = vcmask (!%p157_p3), 785408  }
   0xe   : > { %s4885_s12 = smov (!%p191_p4, %s3034_s12), 1 }
   0xf   : > { %s2989_s16 = smul.u32 432, %s4885_s12  ;;  %s2646_s10 = sshll.u32 %s4885_s12, 6 }
  0x10   : > { %s4710_s17 = scalar_lea.vmem %s4841_s2, %s2646_s10  ;;  %s212_s20 = scalar_lea.vmem %s4842_s3, %s4885_s12 }
  0x11   : > { %s3106_s27 = scalar_lea.vmem %s4839_s0, %s2989_s16 }
  0x12   : > { %v3115_v7 = vld [vmem:[%s3106_s27 + $0x8] sm:$0xff]  ;;  %v218_v8 = vld [vmem:[%s3106_s27 + $0x10] sm:$0x3]  ;;  %v3119_v9 = vld [vmem:[%s3106_s27] sm:$0xff] }
  0x13   : > { %v320_v10 = vrot.slane %v3115_v7, 1  ;;  %v322_v11 = vrot.slane %v218_v8, 1  ;;  %v319_v12 = vrot.slane %v3119_v9, 1  ;;  %v3126_v13 = vld [vmem:[%s3106_s27 + $0x20] sm:$0xff]  ;;  %v221_v14 = vld [vmem:[%s3106_s27 + $0x28] sm:$0x3] }
  0x14   : > { %v325_v15 = vrot.slane %v3126_v13, 1  ;;  %v327_v16 = vrot.slane %v221_v14, 1  ;;  %v3136_v17 = vld [vmem:[%s3106_s27 + $0x18] sm:$0xff]  ;;  %v502_v21 = vrot.slane %v3126_v13, 2  ;;  %v496_v22 = vrot.slane %v3119_v9, 2  ;;  %v3164_v33 = vld [vmem:[%s3106_s27 + $0x30] sm:$0xff] }
  0x15   : > { %v323_v18 = vsel %vm318_vm3, %v320_v10, %v322_v11  ;;  %v321_v19 = vsel %vm318_vm3, %v319_v12, %v320_v10  ;;  %v324_v20 = vrot.slane %v3136_v17, 1  ;;  %v501_v25 = vrot.slane %v3136_v17, 2  ;;  %v3160_v31 = vld [vmem:[%s3106_s27 + $0x38] sm:$0xff]  ;;  %v224_v32 = vld [vmem:[%s3106_s27 + $0x40] sm:$0x3]  ;;  %v3176_v40 = vld [vmem:[%s3106_s27 + $0x50] sm:$0xff] }
  0x16   : > { %401 = vrot.lane.b32.xlu1 %v323_v18, %s3045_s28  ;;  %399 = vrot.lane.b32.xlu0 %v321_v19, %s3045_s28  ;;  %v328_v23 = vsel %vm318_vm3, %v325_v15, %v327_v16  ;;  %v497_v26 = vrot.slane %v3115_v7, 2  ;;  %v504_v29 = vrot.slane %v221_v14, 2  ;;  %v499_v30 = vrot.slane %v218_v8, 2  ;;  %v227_v45 = vld [vmem:[%s3106_s27 + $0x58] sm:$0x3]  ;;  %v3183_v46 = vld [vmem:[%s3106_s27 + $0xc8] sm:$0xff] }
  0x17   : > { %v326_v24 = vsel %vm318_vm3, %v324_v20, %v325_v15  ;;  %v503_v27 = vsel %vm495_vm4, %v501_v25, %v502_v21  ;;  %v330_v34 = vrot.slane %v3160_v31, 1  ;;  %v332_v35 = vrot.slane %v224_v32, 1  ;;  %v3186_v47 = vld [vmem:[%s3106_s27 + $0x48] sm:$0xff]  ;;  %v3189_v48 = vld [vmem:[%s3106_s27 + $0xd0] sm:$0x3]  ;;  %v3192_v49 = vld [vmem:[%s3106_s27 + $0xe0] sm:$0xff] }
  0x18   : > { %v498_v28 = vsel %vm495_vm4, %v496_v22, %v497_v26  ;;  %v505_v36 = vsel %vm495_vm4, %v502_v21, %v504_v29  ;;  %v500_v37 = vsel %vm495_vm4, %v497_v26, %v499_v30  ;;  %v329_v38 = vrot.slane %v3164_v33, 1  ;;  %v245_v53 = vld [vmem:[%s3106_s27 + $0xe8] sm:$0x3]  ;;  %v3205_v59 = vld [vmem:[%s3106_s27 + $0xf8] sm:$0xff]  ;;  %v248_v1 = vld [vmem:[%s3106_s27 + $0x100] sm:$0x3] }
  0x19   : > { %v333_v39 = vsel %vm318_vm3, %v330_v34, %v332_v35  ;;  %v507_v42 = vrot.slane %v3160_v31, 2  ;;  %v509_v43 = vrot.slane %v224_v32, 2  ;;  %v506_v44 = vrot.slane %v3164_v33, 2  ;;  %v3209_v62 = vld [vmem:[%s3106_s27 + $0x68] sm:$0xff]  ;;  %v3221_v3 = vld [vmem:[%s3106_s27 + $0x70] sm:$0x3] }
  0x1a   : > { %405 = vrot.lane.b32.xlu1 %v328_v23, %s3045_s28  ;;  %403 = vrot.lane.b32.xlu0 %v326_v24, %s3045_s28  ;;  %v331_v41 = vsel %vm318_vm3, %v329_v38, %v330_v34  ;;  %v335_v50 = vrot.slane %v3176_v40, 1  ;;  %v337_v51 = vrot.slane %v227_v45, 1  ;;  %v360_v52 = vrot.slane %v3183_v46, 1  ;;  %v3225_v10 = vld [vmem:[%s3106_s27 + $0x110] sm:$0xff]  ;;  %v3230_v14 = vld [vmem:[%s3106_s27 + $0x60] sm:$0xff] }
  0x1b   : > { %v510_v54 = vsel %vm495_vm4, %v507_v42, %v509_v43  ;;  %v508_v55 = vsel %vm495_vm4, %v506_v44, %v507_v42  ;;  %v334_v56 = vrot.slane %v3186_v47, 1  ;;  %v362_v57 = vrot.slane %v3189_v48, 1  ;;  %v251_v18 = vld [vmem:[%s3106_s27 + $0x118] sm:$0x3]  ;;  %v3249_v26 = vld [vmem:[%s3106_s27 + $0x128] sm:$0xff]  ;;  %v3269_v38 = vld [vmem:[%s3106_s27 + $0x140] sm:$0xff] }
  0x1c   : > { %v365_v58 = vrot.slane %v3192_v49, 1  ;;  %v512_v60 = vrot.slane %v3176_v40, 2  ;;  %v514_v61 = vrot.slane %v227_v45, 2  ;;  %v367_v0 = vrot.slane %v245_v53, 1  ;;  %v254_v32 = vld [vmem:[%s3106_s27 + $0x130] sm:$0x3] }
  0x1d   : > { %v3214_v63 = vsel %vm318_vm3, %v360_v52, %v362_v57  ;;  %v338_v2 = vsel %vm318_vm3, %v335_v50, %v337_v51  ;;  %v4858_v4 = vrot.slane %v3192_v49, 2  ;;  %v544_v8 = vrot.slane %v245_v53, 2  ;;  %v257_v42 = vld [vmem:[%s3106_s27 + $0x148] sm:$0x3] }
  0x1e   : > { %580 = vrot.lane.b32.xlu1 %v503_v27, %s3046_s29  ;;  %576 = vrot.lane.b32.xlu0 %v498_v28, %s3046_s29  ;;  %v336_v11 = vsel %vm318_vm3, %v334_v56, %v335_v50  ;;  %v511_v12 = vrot.slane %v3186_v47, 2  ;;  %v3235_v15 = vsel %vm318_vm3, %v365_v58, %v367_v0  ;;  %v4855_v16 = vrot.slane %v3205_v59, 1  ;;  %v3280_v44 = vld [vmem:[%s3106_s27 + $0x88] sm:$0x3] }
  0x1f   : > { %v3242_v19 = vsel %vm495_vm4, %v4858_v4, %v544_v8  ;;  %v372_v20 = vrot.slane %v248_v1, 1  ;;  %v4852_v21 = vrot.slane %v3205_v59, 2  ;;  %v515_v22 = vsel %vm495_vm4, %v512_v60, %v514_v61  ;;  %v260_v8 = vld [vmem:[%s3106_s27 + $0x160] sm:$0x3]  ;;  %v3424_v4 = vld [vmem:[%s3106_s27 + $0xa8] sm:$0xff] }
  0x20   : > { %v340_v23 = vrot.slane %v3209_v62, 1  ;;  %v549_v24 = vrot.slane %v248_v1, 2  ;;  %v4851_v25 = vrot.slane %v3225_v10, 1  ;;  %v342_v27 = vrot.slane %v3221_v3, 1  ;;  %v3302_v1 = vld [vmem:[%s3106_s27 + $0x78] sm:$0xff] }
  0x21   : > { %v339_v28 = vrot.slane %v3230_v14, 1  ;;  %v3258_v29 = vsel %vm318_vm3, %v4855_v16, %v372_v20  ;;  %v377_v30 = vrot.slane %v251_v18, 1  ;;  %v513_v34 = vsel %vm495_vm4, %v511_v12, %v512_v60  ;;  %v3297_v60 = vld [vmem:[%s3106_s27 + $0x158] sm:$0xff]  ;;  %v3317_v20 = vld [vmem:[%s3106_s27 + $0x170] sm:$0xff] }
  0x22   : > { %582 = vrot.lane.b32.xlu1 %v505_v36, %s3046_s29  ;;  %578 = vrot.lane.b32.xlu0 %v500_v37, %s3046_s29  ;;  %v3265_v35 = vsel %vm495_vm4, %v4852_v21, %v549_v24  ;;  %v4849_v36 = vrot.slane %v3225_v10, 2  ;;  %v554_v37 = vrot.slane %v251_v18, 2  ;;  %v517_v43 = vrot.slane %v3209_v62, 2 }
  0x23   : > { %v382_v50 = vrot.slane %v254_v32, 1  ;;  %v4845_v51 = vrot.slane %v3249_v26, 2  ;;  %v519_v53 = vrot.slane %v3221_v3, 2  ;;  %v559_v56 = vrot.slane %v254_v32, 2 }
  0x24   : > { %v3285_v45 = vsel %vm495_vm4, %v4849_v36, %v554_v37  ;;  %v4844_v57 = vrot.slane %v3269_v38, 1  ;;  %v343_v61 = vsel %vm318_vm3, %v340_v23, %v342_v27  ;;  %v341_v0 = vsel %vm318_vm3, %v339_v28, %v340_v23  ;;  %v263_v28 = vld [vmem:[%s3106_s27 + $0x178] sm:$0x3]  ;;  %v236_v36 = vld [vmem:[%s3106_s27 + $0xa0] sm:$0x3] }
  0x25   : > { %v387_v3 = vrot.slane %v257_v42, 1  ;;  %v4843_v12 = vrot.slane %v3269_v38, 2  ;;  %v564_v18 = vrot.slane %v257_v42, 2  ;;  %v347_v23 = vrot.slane %v3280_v44, 1 }
  0x26   : > { %409 = vrot.lane.b32.xlu1 %v333_v39, %s3045_s28  ;;  %407 = vrot.lane.b32.xlu0 %v331_v41, %s3045_s28  ;;  %v3274_v39 = vsel %vm318_vm3, %v4851_v25, %v377_v30  ;;  %v4848_v41 = vrot.slane %v3249_v26, 1  ;;  %v4846_v27 = vrot.slane %v3297_v60, 1  ;;  %v344_v30 = vrot.slane %v3302_v1, 1 }
  0x27   : > { %v3324_v24 = vsel %vm318_vm3, %v4844_v57, %v387_v3  ;;  %v3334_v32 = vsel %vm495_vm4, %v4843_v12, %v564_v18  ;;  %v4847_v37 = vrot.slane %v3297_v60, 2  ;;  %v520_v42 = vsel %vm495_vm4, %v517_v43, %v519_v53  ;;  %v3341_v3 = vld [vmem:[%s3106_s27 + $0x188] sm:$0xff]  ;;  %v266_v57 = vld [vmem:[%s3106_s27 + $0x190] sm:$0x3] }
  0x28   : > { %v397_v12 = vrot.slane %v263_v28, 1  ;;  %v524_v53 = vrot.slane %v3280_v44, 2 }
  0x2a   : > { %586 = vrot.lane.b32.xlu1 %v510_v54, %s3046_s29  ;;  %584 = vrot.lane.b32.xlu0 %v508_v55, %s3046_s29  ;;  %v516_v54 = vrot.slane %v3230_v14, 2  ;;  %v3293_v55 = vld [vmem:[%s3106_s27 + $0x80] sm:$0xff] }
  0x2e   : > { %413 = vrot.lane.b32.xlu1 %v338_v2, %s3045_s28  ;;  %411 = vrot.lane.b32.xlu0 %v336_v11, %s3045_s28  ;;  %v3307_v2 = vsel %vm318_vm3, %v4848_v41, %v382_v50  ;;  %v3313_v11 = vsel %vm495_vm4, %v4845_v51, %v559_v56  ;;  %v518_v50 = vsel %vm495_vm4, %v516_v54, %v517_v43  ;;  %v569_v56 = vrot.slane %v260_v8, 2  ;;  %v3352_v43 = vld [vmem:[%s3106_s27 + $0x98] sm:$0xff]  ;;  %v269_v41 = vld [vmem:[%s3106_s27 + $0x1a8] sm:$0x3] }
  0x2f   : > { %v574_v51 = vrot.slane %v263_v28, 2  ;;  %v521_v28 = vrot.slane %v3302_v1, 2  ;;  %v1338_v21 = vrot.slane %v269_v41, 1 }
  0x30   : > { %v3357_v54 = vsel %vm495_vm4, %v4847_v37, %v569_v56  ;;  %v4854_v56 = vrot.slane %v3341_v3, 1  ;;  %v3371_v37 = vld [vmem:[%s3106_s27 + $0x1a0] sm:$0xff] }
  0x31   : > { %v4857_v25 = vrot.slane %v3371_v37, 1 }
  0x32   : > { %590 = vrot.lane.b32.xlu1 %v515_v22, %s3046_s29  ;;  %588 = vrot.lane.b32.xlu0 %v513_v34, %s3046_s29  ;;  %v345_v22 = vrot.slane %v3293_v55, 1  ;;  %v392_v34 = vrot.slane %v260_v8, 1  ;;  %v4853_v8 = vrot.slane %v3317_v20, 2 }
  0x34   : > { %v3347_v18 = vsel %vm318_vm3, %v4846_v27, %v392_v34  ;;  %v348_v34 = vsel %vm318_vm3, %v345_v22, %v347_v23  ;;  %v346_v27 = vsel %vm318_vm3, %v344_v30, %v345_v22  ;;  %v746_v23 = vrot.slane %v266_v57, 1  ;;  %v3383_v30 = vld [vmem:[%s3106_s27 + $0x90] sm:$0xff] }
  0x35   : > { %v4856_v22 = vrot.slane %v3341_v3, 2  ;;  %v349_v16 = vrot.slane %v3383_v30, 1 }
  0x36   : > { %417 = vrot.lane.b32.xlu1 %v343_v61, %s3045_s28  ;;  %415 = vrot.lane.b32.xlu0 %v341_v0, %s3045_s28  ;;  %v4850_v61 = vrot.slane %v3317_v20, 1  ;;  %v522_v0 = vrot.slane %v3293_v55, 2 }
  0x38   : > { %v3367_v44 = vsel %vm318_vm3, %v4850_v61, %v397_v12  ;;  %v757_v12 = vrot.slane %v266_v57, 2  ;;  %v3389_v61 = vsel %vm318_vm3, %v4854_v56, %v746_v23  ;;  %v4859_v23 = vrot.slane %v3371_v37, 2 }
  0x39   : > { %v523_v56 = vsel %vm495_vm4, %v521_v28, %v522_v0 }
  0x3a   : > { %594 = vrot.lane.b32.xlu1 %v520_v42, %s3046_s29  ;;  %592 = vrot.lane.b32.xlu0 %v518_v50, %s3046_s29  ;;  %v3379_v42 = vsel %vm495_vm4, %v4853_v8, %v574_v51  ;;  %v350_v50 = vrot.slane %v3352_v43, 1  ;;  %v525_v51 = vsel %vm495_vm4, %v522_v0, %v524_v53  ;;  %v352_v8 = vrot.slane %v236_v36, 1 }
  0x3b   : > { %v3398_v57 = vsel %vm495_vm4, %v4856_v22, %v757_v12  ;;  %v1349_v53 = vrot.slane %v269_v41, 2  ;;  %v527_v12 = vrot.slane %v3352_v43, 2  ;;  %v529_v22 = vrot.slane %v236_v36, 2  ;;  %v239_v41 = vld [vmem:[%s3106_s27 + $0xb8] sm:$0x3] }
  0x3c   : > { %v353_v0 = vsel %vm318_vm3, %v350_v50, %v352_v8  ;;  %v351_v28 = vsel %vm318_vm3, %v349_v16, %v350_v50 }
  0x3d   : > { %v530_v8 = vsel %vm495_vm4, %v527_v12, %v529_v22 }
  0x3e   : > { %421 = vrot.lane.b32.xlu1 %v348_v34, %s3045_s28  ;;  %419 = vrot.lane.b32.xlu0 %v346_v27, %s3045_s28  ;;  %v3406_v27 = vsel %vm318_vm3, %v4857_v25, %v1338_v21  ;;  %v3411_v34 = vsel %vm495_vm4, %v4859_v23, %v1349_v53  ;;  %v526_v21 = vrot.slane %v3383_v30, 2  ;;  %v3420_v25 = vld [vmem:[%s3106_s27 + $0xb0] sm:$0xff]  ;;  %v357_v53 = vrot.slane %v239_v41, 1 }
  0x3f   : > { %v355_v16 = vrot.slane %v3420_v25, 1  ;;  %v354_v23 = vrot.slane %v3424_v4, 1 }
  0x40   : > { %v528_v50 = vsel %vm495_vm4, %v526_v21, %v527_v12  ;;  %v531_v12 = vrot.slane %v3424_v4, 2  ;;  %v3450_v21 = vld [vmem:[%s3106_s27 + $0xc0] sm:$0xff] }
  0x41   : > { %v356_v22 = vsel %vm318_vm3, %v354_v23, %v355_v16 }
  0x42   : > { %598 = vrot.lane.b32.xlu1 %v525_v51, %s3046_s29  ;;  %596 = vrot.lane.b32.xlu0 %v523_v56, %s3046_s29  ;;  %v2609_v51 = vld [vmem:[%s4840_s1 + $0x20] sm:$0xff]  ;;  %v2610_v56 = vld [vmem:[%s4840_s1 + $0x28] sm:$0xf] }
  0x43   : > { %v3435_v36 = vpack.c.bf16 %v2610_v56, %v2609_v51  ;;  %v534_v51 = vrot.slane %v239_v41, 2  ;;  %v537_v41 = vrot.slane %v3183_v46, 2 }
  0x45   : > { %2919 = vmatprep.subr.msk.bf16.mxu0 %vm3108_vm2, %v3435_v36 }
  0x46   : > { %425 = vrot.lane.b32.xlu1 %v353_v0, %s3045_s28  ;;  %423 = vrot.lane.b32.xlu0 %v351_v28, %s3045_s28  ;;  %v532_v0 = vrot.slane %v3420_v25, 2  ;;  %v358_v28 = vsel %vm318_vm3, %v355_v16, %v357_v53  ;;  %v539_v16 = vrot.slane %v3189_v48, 2  ;;  %v536_v53 = vrot.slane %v3450_v21, 2 }
  0x48   : > { %v535_v56 = vsel %vm495_vm4, %v532_v0, %v534_v51 }
  0x4a   : > { %602 = vrot.lane.b32.xlu1 %v530_v8, %s3046_s29  ;;  %600 = vrot.lane.b32.xlu0 %v528_v50, %s3046_s29  ;;  %v533_v8 = vsel %vm495_vm4, %v531_v12, %v532_v0  ;;  %v359_v50 = vrot.slane %v3450_v21, 1  ;;  %v540_v0 = vsel %vm495_vm4, %v537_v41, %v539_v16  ;;  %v4862_v12 = vrot.slane %v3192_v49, 2 }
  0x4c   : > { %v361_v23 = vsel %vm318_vm3, %v359_v50, %v360_v52 }
  0x4e   : > { %429 = vrot.lane.b32.xlu1 %v358_v28, %s3045_s28  ;;  %427 = vrot.lane.b32.xlu0 %v356_v22, %s3045_s28  ;;  %v3466_v28 = vld [vmem:[%s3106_s27 + $0xd8] sm:$0xff]  ;;  %v538_v22 = vsel %vm495_vm4, %v536_v53, %v537_v41  ;;  %v4864_v41 = vrot.slane %v3205_v59, 2  ;;  %v4865_v53 = vrot.slane %v3225_v10, 1 }
  0x4f   : > { %v364_v52 = vrot.slane %v3466_v28, 1  ;;  %v541_v51 = vrot.slane %v3466_v28, 2 }
  0x51   : > { %v366_v48 = vsel %vm318_vm3, %v364_v52, %v365_v58  ;;  %v4863_v58 = vrot.slane %v3205_v59, 1  ;;  %v4866_v52 = vrot.slane %v3225_v10, 2 }
  0x52   : > { %606 = vrot.lane.b32.xlu1 %v535_v56, %s3046_s29  ;;  %604 = vrot.lane.b32.xlu0 %v533_v8, %s3046_s29  ;;  %v543_v56 = vsel %vm495_vm4, %v541_v51, %v4862_v12  ;;  %v4867_v51 = vrot.slane %v3249_v26, 1 }
  0x56   : > { %433 = vrot.lane.b32.xlu1 %v3214_v63, %s3045_s28  ;;  %431 = vrot.lane.b32.xlu0 %v361_v23, %s3045_s28  ;;  %v3481_v63 = vld [vmem:[%s3106_s27 + $0xf0] sm:$0xff]  ;;  %v3498_v23 = vld [vmem:[%s3106_s27 + $0x108] sm:$0xff] }
  0x57   : > { %v369_v8 = vrot.slane %v3481_v63, 1  ;;  %v374_v16 = vrot.slane %v3498_v23, 1 }
  0x59   : > { %v371_v50 = vsel %vm318_vm3, %v369_v8, %v4863_v58  ;;  %v4868_v8 = vrot.slane %v3249_v26, 2 }
  0x5a   : > { %610 = vrot.lane.b32.xlu1 %v540_v0, %s3046_s29  ;;  %608 = vrot.lane.b32.xlu0 %v538_v22, %s3046_s29  ;;  %v376_v0 = vsel %vm318_vm3, %v374_v16, %v4865_v53  ;;  %v3515_v22 = vld [vmem:[%s3106_s27 + $0x120] sm:$0xff]  ;;  %v4871_v53 = vrot.slane %v3297_v60, 1 }
  0x5e   : > { %437 = vrot.lane.b32.xlu1 %v3235_v15, %s3045_s28  ;;  %435 = vrot.lane.b32.xlu0 %v366_v48, %s3045_s28  ;;  %v546_v15 = vrot.slane %v3481_v63, 2  ;;  %v379_v48 = vrot.slane %v3515_v22, 1 }
  0x60   : > { %v381_v12 = vsel %vm318_vm3, %v379_v48, %v4867_v51 }
  0x62   : > { %614 = vrot.lane.b32.xlu1 %v3242_v19, %s3046_s29  ;;  %612 = vrot.lane.b32.xlu0 %v543_v56, %s3046_s29  ;;  %v548_v19 = vsel %vm495_vm4, %v546_v15, %v4864_v41  ;;  %v3532_v56 = vld [vmem:[%s3106_s27 + $0x138] sm:$0xff]  ;;  %v3549_v41 = vld [vmem:[%s3106_s27 + $0x150] sm:$0xff] }
  0x63   : > { %v384_v58 = vrot.slane %v3532_v56, 1 }
  0x66   : > { %441 = vrot.lane.b32.xlu1 %v3258_v29, %s3045_s28  ;;  %439 = vrot.lane.b32.xlu0 %v371_v50, %s3045_s28  ;;  %v551_v29 = vrot.slane %v3498_v23, 2  ;;  %v4869_v50 = vrot.slane %v3269_v38, 1 }
  0x68   : > { %v386_v15 = vsel %vm318_vm3, %v384_v58, %v4869_v50  ;;  %v3583_v58 = vld [vmem:[%s3106_s27 + $0x180] sm:$0xff] }
  0x6a   : > { %618 = vrot.lane.b32.xlu1 %v3265_v35, %s3046_s29  ;;  %616 = vrot.lane.b32.xlu0 %v548_v19, %s3046_s29  ;;  %v553_v35 = vsel %vm495_vm4, %v551_v29, %v4866_v52  ;;  %v4870_v19 = vrot.slane %v3269_v38, 2  ;;  %v3566_v29 = vld [vmem:[%s3106_s27 + $0x168] sm:$0xff]  ;;  %v4872_v52 = vrot.slane %v3297_v60, 2 }
  0x6e   : > { %445 = vrot.lane.b32.xlu1 %v3274_v39, %s3045_s28  ;;  %443 = vrot.lane.b32.xlu0 %v376_v0, %s3045_s28  ;;  %v556_v39 = vrot.slane %v3515_v22, 2 }
  0x72   : > { %622 = vrot.lane.b32.xlu1 %v3285_v45, %s3046_s29  ;;  %620 = vrot.lane.b32.xlu0 %v553_v35, %s3046_s29  ;;  %v558_v45 = vsel %vm495_vm4, %v556_v39, %v4868_v8  ;;  %v394_v35 = vrot.slane %v3566_v29, 1 }
  0x76   : > { %449 = vrot.lane.b32.xlu1 %v3307_v2, %s3045_s28  ;;  %447 = vrot.lane.b32.xlu0 %v381_v12, %s3045_s28  ;;  %v561_v2 = vrot.slane %v3532_v56, 2  ;;  %v4873_v12 = vrot.slane %v3317_v20, 1 }
  0x78   : > { %v563_v16 = vsel %vm495_vm4, %v561_v2, %v4870_v19  ;;  %v396_v39 = vsel %vm318_vm3, %v394_v35, %v4873_v12  ;;  %v3617_v12 = vld [vmem:[%s3106_s27 + $0x198] sm:$0xff] }
  0x7a   : > { %626 = vrot.lane.b32.xlu1 %v3313_v11, %s3046_s29  ;;  %624 = vrot.lane.b32.xlu0 %v558_v45, %s3046_s29  ;;  %v389_v11 = vrot.slane %v3549_v41, 1 }
  0x7c   : > { %v391_v0 = vsel %vm318_vm3, %v389_v11, %v4871_v53 }
  0x7e   : > { %453 = vrot.lane.b32.xlu1 %v3324_v24, %s3045_s28  ;;  %451 = vrot.lane.b32.xlu0 %v386_v15, %s3045_s28  ;;  %v566_v24 = vrot.slane %v3549_v41, 2  ;;  %v743_v15 = vrot.slane %v3583_v58, 1 }
  0x82   : > { %630 = vrot.lane.b32.xlu1 %v3334_v32, %s3046_s29  ;;  %628 = vrot.lane.b32.xlu0 %v563_v16, %s3046_s29  ;;  %v568_v32 = vsel %vm495_vm4, %v566_v24, %v4872_v52 }
  0x86   : > { %457 = vrot.lane.b32.xlu1 %v3347_v18, %s3045_s28  ;;  %455 = vrot.lane.b32.xlu0 %v391_v0, %s3045_s28  ;;  %v571_v18 = vrot.slane %v3566_v29, 2  ;;  %v754_v0 = vrot.slane %v3583_v58, 2 }
  0x88   : > { %v402_v48 = vpop.permute.xlu1 %401  ;;  %v400_v51 = vpop.permute.xlu0 %399 }
  0x89   : > { %v673_v2 = vsel %vm672_vm5, %v3119_v9, %v400_v51  ;;  %v4875_v9 = vrot.slane %v3341_v3, 1  ;;  %v674_v24 = vsel %vm672_vm5, %v3115_v7, %v402_v48  ;;  %v4876_v7 = vrot.slane %v3341_v3, 2 }
  0x8a   : > { %634 = vrot.lane.b32.xlu1 %v3357_v54, %s3046_s29  ;;  %632 = vrot.lane.b32.xlu0 %v568_v32, %s3046_s29  ;;  %v4874_v54 = vrot.slane %v3317_v20, 2 }
  0x8c   : > { %v406_v8 = vpop.permute.xlu1 %405  ;;  %v404_v45 = vpop.permute.xlu0 %403  ;;  %v573_v50 = vsel %vm495_vm4, %v571_v18, %v4874_v54 }
  0x8d   : > { %v675_v19 = vsel %vm672_vm5, %v3136_v17, %v404_v45  ;;  %v745_v17 = vsel %vm318_vm3, %v743_v15, %v4875_v9  ;;  %v676_v52 = vsel %vm672_vm5, %v3126_v13, %v406_v8  ;;  %v756_v13 = vsel %vm495_vm4, %v754_v0, %v4876_v7 }
  0x8e   : > { %461 = vrot.lane.b32.xlu1 %v3367_v44, %s3045_s28  ;;  %459 = vrot.lane.b32.xlu0 %v396_v39, %s3045_s28  ;;  %v4878_v15 = vrot.slane %v3371_v37, 2 }
  0x90   : > { %v581_v16 = vpop.permute.xlu1 %580  ;;  %v577_v11 = vpop.permute.xlu0 %576 }
  0x91   : > { %v708_v44 = vsel %vm705_vm6, %v675_v19, %v581_v16  ;;  %v706_v53 = vsel %vm705_vm6, %v673_v2, %v577_v11 }
  0x92   : > { %638 = vrot.lane.b32.xlu1 %v3379_v42, %s3046_s29  ;;  %636 = vrot.lane.b32.xlu0 %v573_v50, %s3046_s29  ;;  %v1346_v50 = vrot.slane %v3617_v12, 2 }
  0x93   : > { %2753 = vmatprep.mubr.msk.f32.mxu1 %vm772_vm7, %v708_v44  ;;  %2805 = vmatprep.mubr.msk.f32.mxu0 %vm772_vm7, %v706_v53 }
  0x94   : > { %v583_v32 = vpop.permute.xlu1 %582  ;;  %v579_v42 = vpop.permute.xlu0 %578  ;;  %v1348_v2 = vsel %vm495_vm4, %v1346_v50, %v4878_v15 }
  0x95   : > { %v709_v35 = vsel %vm705_vm6, %v676_v52, %v583_v32  ;;  %v707_v51 = vsel %vm705_vm6, %v674_v24, %v579_v42 }
  0x96   : > { %750 = vrot.lane.b32.xlu1 %v3389_v61, %s3045_s28  ;;  %748 = vrot.lane.b32.xlu0 %v745_v17, %s3045_s28  ;;  %v1335_v61 = vrot.slane %v3617_v12, 1 }
  0x97   : > { %2754 = vmatmul.mubr.msk.f32.vlgmr.msra.gmra.mrb[0].mxu1 %vm772_vm7, %v709_v35  ;;  %2806 = vmatmul.mubr.msk.f32.vlgmr.msra.gmra.mrb[0].mxu0 %vm772_vm7, %v707_v51 }
  0x98   : > { %2808 = vmatprep.mubr.msk.f32.mxu0 %vm772_vm7, %v708_v44  ;;  %v410_v48 = vpop.permute.xlu1 %409  ;;  %v408_v39 = vpop.permute.xlu0 %407  ;;  %2922 = vmatpush3.bf16.msk.msra.mxu0 %vm3108_vm2, %v3435_v36 }
  0x99   : > { %2924 = vmatpush3.bf16.msk.msra.mxu1 %vm3108_vm2, %v3112_v6  ;;  %v678_v18 = vsel %vm672_vm5, %v3160_v31, %v410_v48  ;;  %v677_v8 = vsel %vm672_vm5, %v3164_v33, %v408_v39  ;;  %v4877_v6 = vrot.slane %v3371_v37, 1  ;;  %vm1806_vm2 = vcmask 516096  }
  0x9a   : > { %761 = vrot.lane.b32.xlu1 %v3398_v57, %s3046_s29  ;;  %759 = vrot.lane.b32.xlu0 %v756_v13, %s3046_s29 }
  0x9b   : > { %2809 = vmatmul.mubr.msk.f32.gmra.mrb[2].mxu0 %vm772_vm7, %v709_v35  ;;  %v1337_v57 = vsel %vm318_vm3, %v1335_v61, %v4877_v6 }
  0x9c   : > { %v587_v36 = vpop.permute.xlu1 %586  ;;  %v585_v45 = vpop.permute.xlu0 %584 }
  0x9d   : > { %v3641_v54 = vsel %vm705_vm6, %v678_v18, %v587_v36  ;;  %v3644_v5 = vsel %vm705_vm6, %v677_v8, %v585_v45 }
  0x9e   : > { %2756 = vmatprep.mubr.msk.f32.mxu1 %vm772_vm7, %v3644_v5  ;;  %2811 = vmatprep.mubr.msk.f32.mxu0 %vm772_vm7, %v3644_v5 }
  0x9f   : > { %2757 = vmatmul.mubr.msk.f32.gmra.mrb[2].mxu1 %vm772_vm7, %v3641_v54  ;;  %2812 = vmatmul.mubr.msk.f32.gmra.mrb[4].mxu0 %vm772_vm7, %v3641_v54 }
  0xa0   : > { %v414_v31 = vpop.permute.xlu1 %413  ;;  %v412_v33 = vpop.permute.xlu0 %411  ;;  %1340 = vrot.lane.b32.xlu0 %v1337_v57, %s3045_s28  ;;  %1342 = vrot.lane.b32.xlu1 %v3406_v27, %s3045_s28 }
  0xa1   : > { %v680_v19 = vsel %vm672_vm5, %v3176_v40, %v414_v31  ;;  %v679_v16 = vsel %vm672_vm5, %v3186_v47, %v412_v33 }
  0xa4   : > { %v591_v11 = vpop.permute.xlu1 %590  ;;  %v589_v44 = vpop.permute.xlu0 %588  ;;  %1351 = vrot.lane.b32.xlu0 %v1348_v2, %s3046_s29  ;;  %1353 = vrot.lane.b32.xlu1 %v3411_v34, %s3046_s29 }
  0xa5   : > { %v3672_v53 = vsel %vm705_vm6, %v680_v19, %v591_v11  ;;  %v712_v27 = vsel %vm705_vm6, %v679_v16, %v589_v44 }
  0xa6   : > { %2759 = vmatprep.mubr.msk.f32.mxu1 %vm772_vm7, %v712_v27  ;;  %2814 = vmatprep.mubr.msk.f32.mxu0 %vm772_vm7, %v712_v27 }
  0xa7   : > { %2760 = vmatmul.mubr.msk.f32.gmra.mrb[4].mxu1 %vm772_vm7, %v3672_v53  ;;  %2815 = vmatmul.mubr.msk.f32.gmra.mrb[6].mxu0 %vm772_vm7, %v3672_v53 }
  0xa8   : > { %v418_v40 = vpop.permute.xlu1 %417  ;;  %v416_v47 = vpop.permute.xlu0 %415 }
  0xa9   : > { %v682_v34 = vsel %vm672_vm5, %v3209_v62, %v418_v40  ;;  %v681_v9 = vsel %vm672_vm5, %v3230_v14, %v416_v47 }
  0xac   : > { %v595_v17 = vpop.permute.xlu1 %594  ;;  %v593_v0 = vpop.permute.xlu0 %592 }
  0xad   : > { %v715_v24 = vsel %vm705_vm6, %v682_v34, %v595_v17  ;;  %v714_v52 = vsel %vm705_vm6, %v681_v9, %v593_v0 }
  0xae   : > { %2762 = vmatprep.mubr.msk.f32.mxu1 %vm772_vm7, %v714_v52  ;;  %2817 = vmatprep.mubr.msk.f32.mxu0 %vm772_vm7, %v714_v52 }
  0xaf   : > { %2763 = vmatmul.mubr.msk.f32.gmra.mrb[6].mxu1 %vm772_vm7, %v715_v24  ;;  %2818 = vmatmul.mubr.msk.f32.gmra.mrb[8].mxu0 %vm772_vm7, %v715_v24 }
  0xb0   : > { %v422_v32 = vpop.permute.xlu1 %421  ;;  %v420_v42 = vpop.permute.xlu0 %419 }
  0xb1   : > { %v684_v62 = vsel %vm672_vm5, %v3293_v55, %v422_v32  ;;  %v683_v14 = vsel %vm672_vm5, %v3302_v1, %v420_v42 }
  0xb4   : > { %v599_v35 = vpop.permute.xlu1 %598  ;;  %v597_v51 = vpop.permute.xlu0 %596 }
  0xb5   : > { %v717_v7 = vsel %vm705_vm6, %v684_v62, %v599_v35  ;;  %v716_v13 = vsel %vm705_vm6, %v683_v14, %v597_v51 }
  0xb6   : > { %2765 = vmatprep.mubr.msk.f32.mxu1 %vm772_vm7, %v716_v13  ;;  %2820 = vmatprep.mubr.msk.f32.mxu0 %vm772_vm7, %v716_v13 }
  0xb7   : > { %2766 = vmatmul.mubr.msk.f32.gmra.mrb[8].mxu1 %vm772_vm7, %v717_v7  ;;  %2821 = vmatmul.mubr.msk.f32.gmra.mrb[10].mxu0 %vm772_vm7, %v717_v7 }
  0xb8   : > { %v426_v48 = vpop.permute.xlu1 %425  ;;  %v424_v39 = vpop.permute.xlu0 %423 }
  0xb9   : > { %v686_v55 = vsel %vm672_vm5, %v3352_v43, %v426_v48  ;;  %v685_v1 = vsel %vm672_vm5, %v3383_v30, %v424_v39 }
  0xbc   : > { %v603_v61 = vpop.permute.xlu1 %602  ;;  %v601_v18 = vpop.permute.xlu0 %600 }
  0xbd   : > { %v719_v8 = vsel %vm705_vm6, %v686_v55, %v603_v61  ;;  %v718_v36 = vsel %vm705_vm6, %v685_v1, %v601_v18 }
  0xbe   : > { %2768 = vmatprep.mubr.msk.f32.mxu1 %vm772_vm7, %v718_v36  ;;  %2823 = vmatprep.mubr.msk.f32.mxu0 %vm772_vm7, %v718_v36 }
  0xbf   : > { %2769 = vmatmul.mubr.msk.f32.gmra.mrb[10].mxu1 %vm772_vm7, %v719_v8  ;;  %2824 = vmatmul.mubr.msk.f32.gmra.mrb[12].mxu0 %vm772_vm7, %v719_v8 }
  0xc0   : > { %v430_v45 = vpop.permute.xlu1 %429  ;;  %v428_v6 = vpop.permute.xlu0 %427 }
  0xc1   : > { %v688_v43 = vsel %vm672_vm5, %v3420_v25, %v430_v45  ;;  %v687_v30 = vsel %vm672_vm5, %v3424_v4, %v428_v6 }
  0xc4   : > { %v607_v57 = vpop.permute.xlu1 %606  ;;  %v605_v50 = vpop.permute.xlu0 %604 }
  0xc5   : > { %v721_v31 = vsel %vm705_vm6, %v688_v43, %v607_v57  ;;  %v720_v33 = vsel %vm705_vm6, %v687_v30, %v605_v50 }
  0xc6   : > { %2771 = vmatprep.mubr.msk.f32.mxu1 %vm772_vm7, %v720_v33  ;;  %2826 = vmatprep.mubr.msk.f32.mxu0 %vm772_vm7, %v720_v33 }
  0xc7   : > { %2772 = vmatmul.mubr.msk.f32.gmra.mrb[12].mxu1 %vm772_vm7, %v721_v31  ;;  %2827 = vmatmul.mubr.msk.f32.gmra.mrb[14].mxu0 %vm772_vm7, %v721_v31 }
  0xc8   : > { %v434_v15 = vpop.permute.xlu1 %433  ;;  %2857 = vmatprep.mubr.msk.f32.mxu0 %vm772_vm7, %v3644_v5  ;;  %v432_v25 = vpop.permute.xlu0 %431 }
  0xc9   : > { %v690_v4 = vsel %vm672_vm5, %v3183_v46, %v434_v15  ;;  %v689_v2 = vsel %vm672_vm5, %v3450_v21, %v432_v25 }
  0xcb   : > { %2858 = vmatmul.mubr.msk.f32.vlgmr.msra.gmra.mrb[0].mxu0 %vm772_vm7, %v3641_v54 }
  0xcc   : > { %v611_v19 = vpop.permute.xlu1 %610  ;;  %2860 = vmatprep.mubr.msk.f32.mxu0 %vm772_vm7, %v712_v27  ;;  %v609_v16 = vpop.permute.xlu0 %608 }
  0xcd   : > { %v3731_v11 = vsel %vm705_vm6, %v690_v4, %v611_v19  ;;  %v3734_v44 = vsel %vm705_vm6, %v689_v2, %v609_v16 }
  0xce   : > { %2774 = vmatprep.mubr.msk.f32.mxu1 %vm772_vm7, %v3734_v44 }
  0xcf   : > { %2775 = vmatmul.mubr.msk.f32.gmra.mrb[14].mxu1 %vm772_vm7, %v3731_v11  ;;  %2861 = vmatmul.mubr.msk.f32.gmra.mrb[2].mxu0 %vm772_vm7, %v3672_v53 }
  0xd0   : > { %v438_v46 = vpop.permute.xlu1 %437  ;;  %2863 = vmatprep.mubr.msk.f32.mxu0 %vm772_vm7, %v714_v52  ;;  %v436_v21 = vpop.permute.xlu0 %435 }
  0xd1   : > { %v692_v54 = vsel %vm672_vm5, %v3192_v49, %v438_v46  ;;  %v691_v5 = vsel %vm672_vm5, %v3466_v28, %v436_v21 }
  0xd3   : > { %2864 = vmatmul.mubr.msk.f32.gmra.mrb[4].mxu0 %vm772_vm7, %v715_v24 }
  0xd4   : > { %v615_v27 = vpop.permute.xlu1 %614  ;;  %2866 = vmatprep.mubr.msk.f32.mxu0 %vm772_vm7, %v716_v13  ;;  %v613_v40 = vpop.permute.xlu0 %612 }
  0xd5   : > { %v3750_v47 = vsel %vm705_vm6, %v692_v54, %v615_v27  ;;  %v3753_v53 = vsel %vm705_vm6, %v691_v5, %v613_v40 }
  0xd6   : > { %2777 = vmatprep.mubr.msk.f32.mxu1 %vm772_vm7, %v3753_v53 }
  0xd7   : > { %2778 = vmatmul.mubr.msk.f32.gmra.mrb[16].mxu1 %vm772_vm7, %v3750_v47  ;;  %2867 = vmatmul.mubr.msk.f32.gmra.mrb[6].mxu0 %vm772_vm7, %v717_v7 }
  0xd8   : > { %v442_v49 = vpop.permute.xlu1 %441  ;;  %2869 = vmatprep.mubr.msk.f32.mxu0 %vm772_vm7, %v718_v36  ;;  %v440_v28 = vpop.permute.xlu0 %439 }
  0xd9   : > { %v694_v34 = vsel %vm672_vm5, %v3205_v59, %v442_v49  ;;  %v693_v9 = vsel %vm672_vm5, %v3481_v63, %v440_v28 }
  0xdb   : > { %2870 = vmatmul.mubr.msk.f32.gmra.mrb[8].mxu0 %vm772_vm7, %v719_v8 }
  0xdc   : > { %v619_v17 = vpop.permute.xlu1 %618  ;;  %2872 = vmatprep.mubr.msk.f32.mxu0 %vm772_vm7, %v720_v33  ;;  %v617_v0 = vpop.permute.xlu0 %616 }
  0xdd   : > { %v3768_v24 = vsel %vm705_vm6, %v694_v34, %v619_v17  ;;  %v3771_v52 = vsel %vm705_vm6, %v693_v9, %v617_v0 }
  0xde   : > { %2780 = vmatprep.mubr.msk.f32.mxu1 %vm772_vm7, %v3771_v52 }
  0xdf   : > { %2781 = vmatmul.mubr.msk.f32.gmra.mrb[18].mxu1 %vm772_vm7, %v3768_v24  ;;  %2873 = vmatmul.mubr.msk.f32.gmra.mrb[10].mxu0 %vm772_vm7, %v721_v31 }
  0xe0   : > { %v446_v59 = vpop.permute.xlu1 %445  ;;  %2875 = vmatprep.mubr.msk.f32.mxu0 %vm772_vm7, %v3734_v44  ;;  %v444_v63 = vpop.permute.xlu0 %443 }
  0xe1   : > { %v696_v32 = vsel %vm672_vm5, %v3225_v10, %v446_v59  ;;  %v695_v42 = vsel %vm672_vm5, %v3498_v23, %v444_v63 }
  0xe3   : > { %2876 = vmatmul.mubr.msk.f32.gmra.mrb[12].mxu0 %vm772_vm7, %v3731_v11 }
  0xe4   : > { %v623_v62 = vpop.permute.xlu1 %622  ;;  %2878 = vmatprep.mubr.msk.f32.mxu0 %vm772_vm7, %v3753_v53  ;;  %v621_v14 = vpop.permute.xlu0 %620 }
  0xe5   : > { %v3789_v35 = vsel %vm705_vm6, %v696_v32, %v623_v62  ;;  %v3792_v51 = vsel %vm705_vm6, %v695_v42, %v621_v14 }
  0xe6   : > { %2783 = vmatprep.mubr.msk.f32.mxu1 %vm772_vm7, %v3792_v51 }
  0xe7   : > { %2784 = vmatmul.mubr.msk.f32.gmra.mrb[20].mxu1 %vm772_vm7, %v3789_v35  ;;  %2879 = vmatmul.mubr.msk.f32.gmra.mrb[14].mxu0 %vm772_vm7, %v3750_v47 }
  0xe8   : > { %v450_v10 = vpop.permute.xlu1 %449  ;;  %2881 = vmatprep.mubr.msk.f32.mxu0 %vm772_vm7, %v3771_v52  ;;  %v448_v23 = vpop.permute.xlu0 %447 }
  0xe9   : > { %v698_v7 = vsel %vm672_vm5, %v3249_v26, %v450_v10  ;;  %v697_v13 = vsel %vm672_vm5, %v3515_v22, %v448_v23 }
  0xeb   : > { %2882 = vmatmul.mubr.msk.f32.gmra.mrb[16].mxu0 %vm772_vm7, %v3768_v24 }
  0xec   : > { %v627_v48 = vpop.permute.xlu1 %626  ;;  %2884 = vmatprep.mubr.msk.f32.mxu0 %vm772_vm7, %v3792_v51  ;;  %v625_v39 = vpop.permute.xlu0 %624 }
  0xed   : > { %v3811_v55 = vsel %vm705_vm6, %v698_v7, %v627_v48  ;;  %v3814_v1 = vsel %vm705_vm6, %v697_v13, %v625_v39 }
  0xee   : > { %2786 = vmatprep.mubr.msk.f32.mxu1 %vm772_vm7, %v3814_v1 }
  0xef   : > { %2787 = vmatmul.mubr.msk.f32.gmra.mrb[22].mxu1 %vm772_vm7, %v3811_v55  ;;  %2885 = vmatmul.mubr.msk.f32.gmra.mrb[18].mxu0 %vm772_vm7, %v3789_v35 }
  0xf0   : > { %v454_v26 = vpop.permute.xlu1 %453  ;;  %2887 = vmatprep.mubr.msk.f32.mxu0 %vm772_vm7, %v3814_v1  ;;  %v452_v22 = vpop.permute.xlu0 %451 }
  0xf1   : > { %v700_v61 = vsel %vm672_vm5, %v3269_v38, %v454_v26  ;;  %v699_v18 = vsel %vm672_vm5, %v3532_v56, %v452_v22 }
  0xf3   : > { %2888 = vmatmul.mubr.msk.f32.gmra.mrb[20].mxu0 %vm772_vm7, %v3811_v55 }
  0xf4   : > { %v631_v8 = vpop.permute.xlu1 %630  ;;  %v629_v36 = vpop.permute.xlu0 %628 }
  0xf5   : > { %v3831_v45 = vsel %vm705_vm6, %v700_v61, %v631_v8  ;;  %v732_v6 = vsel %vm705_vm6, %v699_v18, %v629_v36 }
  0xf6   : > { %2789 = vmatprep.mubr.msk.f32.mxu1 %vm772_vm7, %v732_v6  ;;  %2890 = vmatprep.mubr.msk.f32.mxu0 %vm772_vm7, %v732_v6 }
  0xf7   : > { %2790 = vmatmul.mubr.msk.f32.gmra.mrb[24].mxu1 %vm772_vm7, %v3831_v45  ;;  %2891 = vmatmul.mubr.msk.f32.gmra.mrb[22].mxu0 %vm772_vm7, %v3831_v45 }
  0xf8   : > { %v458_v38 = vpop.permute.xlu1 %457  ;;  %v456_v43 = vpop.permute.xlu0 %455 }
  0xf9   : > { %v702_v56 = vsel %vm672_vm5, %v3297_v60, %v458_v38  ;;  %v701_v30 = vsel %vm672_vm5, %v3549_v41, %v456_v43 }
  0xfc   : > { %v635_v57 = vpop.permute.xlu1 %634  ;;  %v633_v50 = vpop.permute.xlu0 %632 }
  0xfd   : > { %v735_v31 = vsel %vm705_vm6, %v702_v56, %v635_v57  ;;  %v734_v33 = vsel %vm705_vm6, %v701_v30, %v633_v50 }
  0xfe   : > { %2792 = vmatprep.mubr.msk.f32.mxu1 %vm772_vm7, %v734_v33  ;;  %2893 = vmatprep.mubr.msk.f32.mxu0 %vm772_vm7, %v734_v33 }
  0xff   : > { %2793 = vmatmul.mubr.msk.f32.gmra.mrb[26].mxu1 %vm772_vm7, %v735_v31  ;;  %2894 = vmatmul.mubr.msk.f32.gmra.mrb[24].mxu0 %vm772_vm7, %v735_v31 }
 0x100   : > { %v462_v15 = vpop.permute.xlu1 %461  ;;  %v460_v25 = vpop.permute.xlu0 %459 }
 0x101   : > { %v704_v60 = vsel %vm672_vm5, %v3317_v20, %v462_v15  ;;  %v703_v41 = vsel %vm672_vm5, %v3566_v29, %v460_v25 }
 0x104   : > { %v639_v4 = vpop.permute.xlu1 %638  ;;  %v637_v2 = vpop.permute.xlu0 %636 }
 0x105   : > { %v737_v19 = vsel %vm705_vm6, %v704_v60, %v639_v4  ;;  %v736_v16 = vsel %vm705_vm6, %v703_v41, %v637_v2 }
 0x106   : > { %2795 = vmatprep.mubr.msk.f32.mxu1 %vm772_vm7, %v736_v16  ;;  %2896 = vmatprep.mubr.msk.f32.mxu0 %vm772_vm7, %v736_v16 }
 0x107   : > { %2796 = vmatmul.mubr.msk.f32.gmra.mrb[28].mxu1 %vm772_vm7, %v737_v19  ;;  %2897 = vmatmul.mubr.msk.f32.gmra.mrb[26].mxu0 %vm772_vm7, %v737_v19 }
 0x108   : > { %v751_v46 = vpop.permute.xlu1 %750  ;;  %v749_v21 = vpop.permute.xlu0 %748 }
 0x109   : > { %v766_v20 = vsel %vm672_vm5, %v3341_v3, %v751_v46  ;;  %v765_v29 = vsel %vm672_vm5, %v3583_v58, %v749_v21 }
 0x10c   : > { %v762_v54 = vpop.permute.xlu1 %761  ;;  %v760_v5 = vpop.permute.xlu0 %759 }
 0x10d   : > { %v768_v27 = vsel %vm705_vm6, %v766_v20, %v762_v54  ;;  %v767_v40 = vsel %vm705_vm6, %v765_v29, %v760_v5 }
 0x10e   : > { %2798 = vmatprep.mubr.msk.f32.mxu1 %vm772_vm7, %v767_v40  ;;  %2899 = vmatprep.mubr.msk.f32.mxu0 %vm772_vm7, %v767_v40 }
 0x10f   : > { %2799 = vmatmul.mubr.msk.f32.gmra.mrb[30].mxu1 %vm772_vm7, %v768_v27  ;;  %2900 = vmatmul.mubr.msk.f32.gmra.mrb[28].mxu0 %vm772_vm7, %v768_v27 }
 0x110   : > { %2829 = vmatprep.mubr.msk.f32.mxu1 %vm772_vm7, %v3734_v44 }
 0x112   : > { %v1341_v3 = vpop.permute.xlu0 %1340  ;;  %v1343_v49 = vpop.permute.xlu1 %1342 }
 0x113   : > { %2830 = vmatmul.mubr.msk.f32.vlgmr.msra.gmra.mrb[16].mxu1 %vm772_vm7, %v3731_v11  ;;  %v1357_v58 = vsel %vm672_vm5, %v3617_v12, %v1341_v3  ;;  %v1358_v28 = vsel %vm672_vm5, %v3371_v37, %v1343_v49 }
 0x114   : > { %2832 = vmatprep.mubr.msk.f32.mxu1 %vm772_vm7, %v3753_v53 }
 0x116   : > { %v1352_v34 = vpop.permute.xlu0 %1351  ;;  %v1354_v9 = vpop.permute.xlu1 %1353 }
 0x117   : > { %2833 = vmatmul.mubr.msk.f32.gmra.mrb[18].mxu1 %vm772_vm7, %v3750_v47  ;;  %v1359_v44 = vsel %vm705_vm6, %v1357_v58, %v1352_v34  ;;  %v1360_v17 = vsel %vm705_vm6, %v1358_v28, %v1354_v9 }
 0x118   : > { %2835 = vmatprep.mubr.msk.f32.mxu1 %vm772_vm7, %v3771_v52  ;;  %2902 = vmatprep.mubr.msk.f32.mxu0 %vm772_vm7, %v1359_v44 }
 0x119   : > { %2903 = vmatmul.mubr.msk.f32.gmra.mrb[30].mxu0 %vm772_vm7, %v1360_v17 }
 0x11b   : > { %2836 = vmatmul.mubr.msk.f32.gmra.mrb[20].mxu1 %vm772_vm7, %v3768_v24 }
 0x11c   : > { %2838 = vmatprep.mubr.msk.f32.mxu1 %vm772_vm7, %v3792_v51 }
 0x11f   : > { %2839 = vmatmul.mubr.msk.f32.gmra.mrb[22].mxu1 %vm772_vm7, %v3789_v35 }
 0x120   : > { %2841 = vmatprep.mubr.msk.f32.mxu1 %vm772_vm7, %v3814_v1 }
 0x123   : > { %2842 = vmatmul.mubr.msk.f32.gmra.mrb[24].mxu1 %vm772_vm7, %v3811_v55 }
 0x124   : > { %2844 = vmatprep.mubr.msk.f32.mxu1 %vm772_vm7, %v732_v6 }
 0x127   : > { %2845 = vmatmul.mubr.msk.f32.gmra.mrb[26].mxu1 %vm772_vm7, %v3831_v45 }
 0x128   : > { %2847 = vmatprep.mubr.msk.f32.mxu1 %vm772_vm7, %v734_v33 }
 0x12b   : > { %2848 = vmatmul.mubr.msk.f32.gmra.mrb[28].mxu1 %vm772_vm7, %v735_v31 }
 0x12c   : > { %2850 = vmatprep.mubr.msk.f32.mxu1 %vm772_vm7, %v736_v16 }
 0x12f   : > { %2851 = vmatmul.mubr.msk.f32.gmra.mrb[30].mxu1 %vm772_vm7, %v737_v19 }
 0x16a   : > { %v2755_v37 = vpop.f32.mrb[0].mxu1 }
 0x16b   : > { %v939_v12 = vpop.f32.mrb[1].mxu1 }
 0x172   : > { %v2758_v11 = vpop.f32.mrb[2].mxu1 }
 0x173   : > { %v949_v47 = vpop.f32.mrb[3].mxu1 }
 0x17a   : > { %v2761_v53 = vpop.f32.mrb[4].mxu1 }
 0x17b   : > { %v959_v0 = vpop.f32.mrb[5].mxu1 }
 0x182   : > { %v2764_v24 = vpop.f32.mrb[6].mxu1 }
 0x183   : > { %v969_v52 = vpop.f32.mrb[7].mxu1 }
 0x18a   : > { %v3905_v59 = vpop.f32.mrb[8].mxu1 }
 0x18b   : > { %v3907_v63 = vpop.f32.mrb[9].mxu1 }
 0x192   : > { %v3909_v32 = vpop.f32.mrb[10].mxu1 }
 0x193   : > { %v3911_v42 = vpop.f32.mrb[11].mxu1 }
 0x19a   : > { %v3913_v62 = vpop.f32.mrb[12].mxu1 }
 0x19b   : > { %v3915_v14 = vpop.f32.mrb[13].mxu1 }
 0x19e   : > { %v2859_v35 = vpop.f32.mrb[0].mxu0 }
 0x19f   : > { %v3917_v51 = vadd.f32 %v2859_v35, %v2755_v37  ;;  %v1439_v10 = vpop.f32.mrb[1].mxu0 }
 0x1a0   : > { %v3919_v23 = vadd.f32 %v1439_v10, %v939_v12 }
 0x1a1   : > { %v1701_v7 = vmul.f32 %v3917_v51, %v3917_v51  ;;  %v1632_v13 = vsel %vm1630_vm8, %v3917_v51, 0.0  ;;  %v2141_v18 = vrot.slane %v3917_v51, 1  ;;  %v2209_v43 = vrot.slane %v3917_v51, 3 }
 0x1a2   : > { %v1631_v48 = vsel %vm1630_vm8, %v3919_v23, 0.0  ;;  %v1700_v39 = vmul.f32 %v3919_v23, %v3919_v23  ;;  %v3929_v55 = vpop.f32.mrb[14].mxu1  ;;  %v2862_v1 = vpop.f32.mrb[2].mxu0  ;;  %v2061_v28 = vrot.slane %v3919_v23, 7 }
 0x1a3   : > { %v3931_v26 = vadd.f32 %v2862_v1, %v2758_v11  ;;  %v3933_v22 = vpop.f32.mrb[15].mxu1  ;;  %v1449_v61 = vpop.f32.mrb[3].mxu0  ;;  %v1733_v8 = vsel %vm1630_vm8, %v1701_v7, 0.0  ;;  %v1633_v6 = vadd.f32 %v1632_v13, %v1631_v48 }
 0x1a4   : > { %v1732_v36 = vsel %vm1630_vm8, %v1700_v39, 0.0  ;;  %v3938_v45 = vadd.f32 %v1449_v61, %v949_v47  ;;  %v2273_v47 = vrot.slane %v3917_v51, 5  ;;  %v1929_v39 = vrot.slane %v3919_v23, 3 }
 0x1a5   : > { %v2142_v38 = vsel %vm1825_vm9, %v3931_v26, %v2141_v18  ;;  %v1703_v56 = vmul.f32 %v3931_v26, %v3931_v26  ;;  %v2210_v31 = vrot.slane %v3931_v26, 2  ;;  %v1734_v33 = vadd.f32 %v1733_v8, %v1732_v36 }
 0x1a6   : > { %v1634_v30 = vsel %vm1630_vm8, %v3938_v45, 0.0  ;;  %v1702_v57 = vmul.f32 %v3938_v45, %v3938_v45  ;;  %v2865_v50 = vpop.f32.mrb[4].mxu0  ;;  %v1636_v41 = vsel %vm1630_vm8, %v3931_v26, 0.0 }
 0x1a7   : > { %v1635_v15 = vadd.f32 %v1634_v30, %v1633_v6  ;;  %v3950_v25 = vadd.f32 %v2865_v50, %v2761_v53  ;;  %v1459_v60 = vpop.f32.mrb[5].mxu0  ;;  %v3958_v19 = vsel %vm1825_vm9, %v2210_v31, %v2209_v43  ;;  %v1737_v20 = vsel %vm1630_vm8, %v1703_v56, 0.0 }
 0x1a8   : > { %v1735_v4 = vsel %vm1630_vm8, %v1702_v57, 0.0  ;;  %v3955_v2 = vadd.f32 %v1459_v60, %v959_v0 }
 0x1a9   : > { %v1736_v16 = vadd.f32 %v1735_v4, %v1734_v33  ;;  %v1705_v46 = vmul.f32 %v3950_v25, %v3950_v25  ;;  %v1637_v21 = vadd.f32 %v1636_v41, %v1635_v15  ;;  %v2143_v27 = vrot.slane %v3950_v25, 7 }
 0x1aa   : > { %v1638_v29 = vsel %vm1630_vm8, %v3955_v2, 0.0  ;;  %v1704_v54 = vmul.f32 %v3955_v2, %v3955_v2  ;;  %v2868_v5 = vpop.f32.mrb[6].mxu0  ;;  %v1640_v34 = vsel %vm1630_vm8, %v3950_v25, 0.0  ;;  %v2064_v57 = vrot.slane %v3955_v2, 5 }
 0x1ab   : > { %v1639_v40 = vadd.f32 %v1638_v29, %v1637_v21  ;;  %v1738_v3 = vadd.f32 %v1737_v20, %v1736_v16  ;;  %v3968_v49 = vadd.f32 %v2868_v5, %v2764_v24  ;;  %v1469_v58 = vpop.f32.mrb[7].mxu0  ;;  %v2144_v17 = vsel %vm1828_vm10, %v2143_v27, %v2142_v38 }
 0x1ac   : > { %v1739_v9 = vsel %vm1630_vm8, %v1704_v54, 0.0  ;;  %v3974_v44 = vadd.f32 %v1469_v58, %v969_v52  ;;  %v1741_v37 = vsel %vm1630_vm8, %v1705_v46, 0.0  ;;  %v2062_v38 = vrot.slane %v3938_v45, 6 }
 0x1ad   : > { %v1740_v12 = vadd.f32 %v1739_v9, %v1738_v3  ;;  %v1641_v11 = vadd.f32 %v1640_v34, %v1639_v40  ;;  %v1707_v53 = vmul.f32 %v3968_v49, %v3968_v49  ;;  %v2145_v52 = vrot.slane %v3968_v49, 6 }
 0x1ae   : > { %v1642_v0 = vsel %vm1630_vm8, %v3974_v44, 0.0  ;;  %v1706_v24 = vmul.f32 %v3974_v44, %v3974_v44  ;;  %v2871_v35 = vpop.f32.mrb[8].mxu0  ;;  %v1644_v1 = vsel %vm1630_vm8, %v3968_v49, 0.0  ;;  %v2066_v60 = vrot.slane %v3974_v44, 4 }
 0x1af   : > { %v1643_v10 = vadd.f32 %v1642_v0, %v1641_v11  ;;  %v1742_v7 = vadd.f32 %v1741_v37, %v1740_v12  ;;  %v3987_v13 = vadd.f32 %v2871_v35, %v3905_v59  ;;  %v1479_v48 = vpop.f32.mrb[9].mxu0  ;;  %v2146_v8 = vsel %vm1831_vm11, %v2145_v52, %v2144_v17 }
 0x1b0   : > { %v1743_v61 = vsel %vm1630_vm8, %v1706_v24, 0.0  ;;  %v3994_v18 = vadd.f32 %v1479_v48, %v3907_v63  ;;  %v2175_v59 = vrot.slane %v3917_v51, 2  ;;  %v1745_v43 = vsel %vm1630_vm8, %v1707_v53, 0.0 }
 0x1b1   : > { %v1744_v36 = vadd.f32 %v1743_v61, %v1742_v7  ;;  %v1645_v6 = vadd.f32 %v1644_v1, %v1643_v10  ;;  %v2147_v63 = vrot.slane %v3987_v13, 5  ;;  %v1648_v41 = vsel %vm1630_vm8, %v3987_v13, 0.0 }
 0x1b2   : > { %v1646_v56 = vsel %vm1630_vm8, %v3994_v18, 0.0  ;;  %v2874_v30 = vpop.f32.mrb[10].mxu0  ;;  %v2068_v16 = vrot.slane %v3994_v18, 3  ;;  %v2063_v20 = vsel %vm1825_vm9, %v2062_v38, %v2061_v28  ;;  %v2307_v29 = vrot.slane %v3917_v51, 6 }
 0x1b3   : > { %v1647_v50 = vadd.f32 %v1646_v56, %v1645_v6  ;;  %v4004_v31 = vadd.f32 %v1745_v43, %v1744_v36  ;;  %v4007_v33 = vadd.f32 %v2874_v30, %v3909_v32  ;;  %v1489_v15 = vpop.f32.mrb[11].mxu0  ;;  %v2148_v46 = vsel %vm1834_vm12, %v2147_v63, %v2146_v8 }
 0x1b4   : > { %v4013_v4 = vadd.f32 %v1489_v15, %v3911_v42  ;;  %v2274_v32 = vrot.slane %v3931_v26, 4  ;;  %v1709_v54 = vmul.f32 %v3987_v13, %v3987_v13  ;;  %v2065_v27 = vsel %vm1828_vm10, %v2064_v57, %v2063_v20 }
 0x1b5   : > { %v4017_v21 = vadd.f32 %v1648_v41, %v1647_v50  ;;  %v2149_v40 = vrot.slane %v4007_v33, 4  ;;  %v2067_v28 = vsel %vm1831_vm11, %v2066_v60, %v2065_v27  ;;  %v2212_v34 = vrot.slane %v3950_v25, 1 }
 0x1b6   : > { %v2877_v5 = vpop.f32.mrb[12].mxu0  ;;  %v2070_v42 = vrot.slane %v4013_v4, 2  ;;  %v2215_v9 = vrot.slane %v3987_v13, 7  ;;  %v4035_v17 = vmul.f32 %v3994_v18, %v3994_v18  ;;  %v2069_v12 = vsel %vm1834_vm12, %v2068_v16, %v2067_v28 }
 0x1b7   : > { %v4028_v3 = vadd.f32 %v2877_v5, %v3913_v62  ;;  %v1499_v58 = vpop.f32.mrb[13].mxu0  ;;  %v2150_v11 = vsel %vm1837_vm13, %v2149_v40, %v2148_v46  ;;  %v2213_v53 = vsel %vm1828_vm10, %v2212_v34, %v3958_v19  ;;  %v2217_v0 = vrot.slane %v4007_v33, 6 }
 0x1b8   : > { %v4038_v37 = vadd.f32 %v1499_v58, %v3915_v14  ;;  %v4048_v35 = vsel %vm1630_vm8, %v1709_v54, 0.0  ;;  %v2071_v14 = vsel %vm1837_vm13, %v2070_v42, %v2069_v12  ;;  %v2214_v7 = vsel %vm1831_vm11, %v3968_v49, %v2213_v53 }
 0x1b9   : > { %v2151_v62 = vrot.slane %v4028_v3, 3  ;;  %v2219_v24 = vrot.slane %v4028_v3, 5  ;;  %v2216_v61 = vsel %vm1834_vm12, %v2215_v9, %v2214_v7  ;;  %v2275_v8 = vsel %vm1825_vm9, %v2274_v32, %v2273_v47 }
 0x1ba   : > { %v2880_v52 = vpop.f32.mrb[14].mxu0  ;;  %v2072_v10 = vrot.slane %v4038_v37, 1  ;;  %v2218_v38 = vsel %vm1837_vm13, %v2217_v0, %v2216_v61  ;;  %v2276_v43 = vrot.slane %v3950_v25, 3  ;;  %v2278_v57 = vrot.slane %v3968_v49, 2 }
 0x1bb   : > { %v4055_v48 = vadd.f32 %v2880_v52, %v3929_v55  ;;  %v1509_v1 = vpop.f32.mrb[15].mxu0  ;;  %v2152_v19 = vsel %vm1840_vm14, %v2151_v62, %v2150_v11  ;;  %v2220_v56 = vsel %vm1840_vm14, %v2219_v24, %v2218_v38  ;;  %v2280_v50 = vrot.slane %v3987_v13, 1 }
 0x1bc   : > { %v4063_v36 = vadd.f32 %v1509_v1, %v3933_v22  ;;  %v2073_v6 = vsel %vm1840_vm14, %v2072_v10, %v2071_v14  ;;  %v2277_v47 = vsel %vm1828_vm10, %v2276_v43, %v2275_v8  ;;  %v2283_v15 = vrot.slane %v4028_v3, 7 }
 0x1bd   : > { %v2153_v55 = vrot.slane %v4055_v48, 2  ;;  %v2221_v30 = vrot.slane %v4055_v48, 4  ;;  %v2279_v46 = vsel %vm1831_vm11, %v2278_v57, %v2277_v47  ;;  %v2285_v20 = vrot.slane %v4055_v48, 6 }
 0x1be   : > { %v4072_v63 = vpop.f32.mrb[16].mxu0  ;;  %v2074_v22 = vsel %vm1843_vm15, %v4063_v36, %v2073_v6  ;;  %v2281_v32 = vsel %vm1834_vm12, %v2280_v50, %v2279_v46  ;;  %v1930_v54 = vrot.slane %v3938_v45, 2  ;;  %v1932_v5 = vrot.slane %v3955_v2, 1 }
 0x1bf   : > { %2089 = vrot.lane.b32.xlu1 %v2074_v22, %s3047_s7  ;;  %v4080_v60 = vpop.f32.mrb[17].mxu0  ;;  %v2154_v41 = vsel %vm1843_vm15, %v2153_v55, %v2152_v19  ;;  %v2222_v16 = vsel %vm1843_vm15, %v2221_v30, %v2220_v56  ;;  %v1935_v27 = vrot.slane %v3994_v18, 7  ;;  %v2282_v42 = vsel %vm1837_vm13, %v4007_v33, %v2281_v32 }
 0x1c0   : > { %2169 = vrot.lane.b32.xlu0 %v2154_v41, %s3048_s8  ;;  %v1937_v40 = vrot.slane %v4013_v4, 6  ;;  %v1939_v58 = vrot.slane %v4038_v37, 5  ;;  %v1941_v28 = vrot.slane %v4063_v36, 4  ;;  %v2284_v9 = vsel %vm1840_vm14, %v2283_v15, %v2282_v42 }
 0x1c1   : > { %v1931_v12 = vsel %vm1825_vm9, %v1930_v54, %v1929_v39  ;;  %v2176_v11 = vrot.slane %v3931_v26, 1  ;;  %v2179_v62 = vrot.slane %v3968_v49, 7  ;;  %v2286_v0 = vsel %vm1843_vm15, %v2285_v20, %v2284_v9 }
 0x1c2   : > { %v4096_v34 = vpop.f32.mrb[18].mxu0  ;;  %v1933_v24 = vsel %vm1828_vm10, %v1932_v5, %v1931_v12  ;;  %v2181_v52 = vrot.slane %v3987_v13, 6  ;;  %v2183_v14 = vrot.slane %v4007_v33, 5  ;;  %v2185_v7 = vrot.slane %v4028_v3, 4 }
 0x1c3   : > { %2237 = vrot.lane.b32.xlu1 %v2222_v16, %s3047_s7  ;;  %v4105_v53 = vpop.f32.mrb[19].mxu0  ;;  %v1934_v39 = vsel %vm1831_vm11, %v3974_v44, %v1933_v24  ;;  %v2177_v10 = vsel %vm1825_vm9, %v2176_v11, %v2175_v59  ;;  %v2187_v1 = vrot.slane %v4055_v48, 3  ;;  %v2308_v8 = vrot.slane %v3931_v26, 5 }
 0x1c4   : > { %2301 = vrot.lane.b32.xlu0 %v2286_v0, %s3048_s8  ;;  %v1936_v19 = vsel %vm1834_vm12, %v1935_v27, %v1934_v39  ;;  %v2178_v61 = vsel %vm1828_vm10, %v3950_v25, %v2177_v10  ;;  %v2310_v6 = vrot.slane %v3950_v25, 4  ;;  %v2312_v59 = vrot.slane %v3968_v49, 3 }
 0x1c5   : > { %v1938_v43 = vsel %vm1837_vm13, %v1937_v40, %v1936_v19  ;;  %v2180_v55 = vsel %vm1831_vm11, %v2179_v62, %v2178_v61  ;;  %v2314_v56 = vrot.slane %v3987_v13, 2  ;;  %v2309_v47 = vsel %vm1825_vm9, %v2308_v8, %v2307_v29 }
 0x1c6   : > { %v4124_v38 = vpop.f32.mrb[20].mxu0  ;;  %v1940_v30 = vsel %vm1840_vm14, %v1939_v58, %v1938_v43  ;;  %v2182_v22 = vsel %vm1834_vm12, %v2181_v52, %v2180_v55  ;;  %v2316_v50 = vrot.slane %v4007_v33, 1  ;;  %v1747_v15 = vsel %vm1630_vm8, %v4035_v17, 0.0 }
 0x1c7   : > { %v4131_v57 = vpop.f32.mrb[21].mxu0  ;;  %v1942_v41 = vsel %vm1843_vm15, %v1941_v28, %v1940_v30  ;;  %v2184_v16 = vsel %vm1837_vm13, %v2183_v14, %v2182_v22  ;;  %v2311_v46 = vsel %vm1828_vm10, %v2310_v6, %v2309_v47  ;;  %v1861_v54 = vrot.slane %v3919_v23, 1 }
 0x1c8   : > { %1957 = vrot.lane.b32.xlu1 %v1942_v41, %s3047_s7  ;;  %v2186_v20 = vsel %vm1840_vm14, %v2185_v7, %v2184_v16  ;;  %v2313_v32 = vsel %vm1831_vm11, %v2312_v59, %v2311_v46  ;;  %v1863_v29 = vrot.slane %v3955_v2, 7  ;;  %v2319_v42 = vrot.slane %v4055_v48, 7 }
 0x1c9   : > { %v2188_v5 = vsel %vm1843_vm15, %v2187_v1, %v2186_v20  ;;  %v2315_v17 = vsel %vm1834_vm12, %v2314_v56, %v2313_v32  ;;  %v1865_v40 = vrot.slane %v3974_v44, 6  ;;  %v4155_v58 = vadd.f32 %v1747_v15, %v4004_v31 }
 0x1ca   : > { %v4149_v27 = vpop.f32.mrb[22].mxu0  ;;  %2203 = vrot.lane.b32.xlu0 %v2188_v5, %s3049_s9  ;;  %v2317_v9 = vsel %vm1837_vm13, %v2316_v50, %v2315_v17  ;;  %v1862_v12 = vsel %vm1825_vm9, %v3938_v45, %v1861_v54  ;;  %v1867_v11 = vrot.slane %v3994_v18, 5  ;;  %v1869_v31 = vrot.slane %v4013_v4, 4 }
 0x1cb   : > { %v4158_v28 = vpop.f32.mrb[23].mxu0  ;;  %v2318_v62 = vsel %vm1840_vm14, %v4028_v3, %v2317_v9  ;;  %v1864_v0 = vsel %vm1828_vm10, %v1863_v29, %v1862_v12  ;;  %v1871_v24 = vrot.slane %v4038_v37, 3  ;;  %v1873_v52 = vrot.slane %v4063_v36, 2 }
 0x1cc   : > { %v1993_v14 = vrot.slane %v3919_v23, 5  ;;  %v1994_v39 = vrot.slane %v3938_v45, 4  ;;  %v1996_v10 = vrot.slane %v3955_v2, 3  ;;  %v2320_v7 = vsel %vm1843_vm15, %v2319_v42, %v2318_v62 }
 0x1cd   : > { %v1866_v1 = vsel %vm1831_vm11, %v1865_v40, %v1864_v0  ;;  %v1998_v19 = vrot.slane %v3974_v44, 2  ;;  %v2000_v61 = vrot.slane %v3994_v18, 1  ;;  %v1710_v8 = vmul.f32 %v4013_v4, %v4013_v4 }
 0x1ce   : > { %2335 = vrot.lane.b32.xlu0 %v2320_v7, %s3049_s9  ;;  %v1868_v6 = vsel %vm1834_vm12, %v1867_v11, %v1866_v1  ;;  %v1995_v43 = vsel %vm1825_vm9, %v1994_v39, %v1993_v14  ;;  %v2003_v55 = vrot.slane %v4038_v37, 7  ;;  %v1895_v30 = vrot.slane %v3919_v23, 2 }
 0x1cf   : > { %v1870_v59 = vsel %vm1837_vm13, %v1869_v31, %v1868_v6  ;;  %v1997_v56 = vsel %vm1828_vm10, %v1996_v10, %v1995_v43  ;;  %v1896_v22 = vrot.slane %v3938_v45, 1  ;;  %v2005_v15 = vrot.slane %v4063_v36, 6 }
 0x1d0   : > { %v1872_v47 = vsel %vm1840_vm14, %v1871_v24, %v1870_v59  ;;  %v1999_v50 = vsel %vm1831_vm11, %v1998_v19, %v1997_v56  ;;  %v1899_v41 = vrot.slane %v3974_v44, 7  ;;  %v1901_v54 = vrot.slane %v3994_v18, 6 }
 0x1d1   : > { %v1874_v16 = vsel %vm1843_vm15, %v1873_v52, %v1872_v47  ;;  %v2001_v20 = vsel %vm1834_vm12, %v2000_v61, %v1999_v50  ;;  %v1897_v32 = vsel %vm1825_vm9, %v1896_v22, %v1895_v30  ;;  %v1903_v5 = vrot.slane %v4013_v4, 5 }
 0x1d2   : > { %v4192_v46 = vpop.f32.mrb[24].mxu0  ;;  %1889 = vrot.lane.b32.xlu0 %v1874_v16, %s3048_s8  ;;  %v1905_v17 = vrot.slane %v4038_v37, 4  ;;  %v2027_v42 = vrot.slane %v3919_v23, 6  ;;  %v2028_v40 = vrot.slane %v3938_v45, 5  ;;  %v2002_v9 = vsel %vm1837_vm13, %v4013_v4, %v2001_v20 }
 0x1d3   : > { %v4198_v29 = vpop.f32.mrb[25].mxu0  ;;  %v1907_v12 = vrot.slane %v4063_v36, 3  ;;  %v2030_v11 = vrot.slane %v3955_v2, 4  ;;  %v2032_v62 = vrot.slane %v3974_v44, 3  ;;  %v2004_v0 = vsel %vm1840_vm14, %v2003_v55, %v2002_v9 }
 0x1d4   : > { %v1898_v31 = vsel %vm1828_vm10, %v3955_v2, %v1897_v32  ;;  %v2029_v24 = vsel %vm1825_vm9, %v2028_v40, %v2027_v42  ;;  %v2034_v52 = vrot.slane %v3994_v18, 2  ;;  %v2006_v14 = vsel %vm1843_vm15, %v2005_v15, %v2004_v0 }
 0x1d5   : > { %v1900_v39 = vsel %vm1831_vm11, %v1899_v41, %v1898_v31  ;;  %v2031_v10 = vsel %vm1828_vm10, %v2030_v11, %v2029_v24  ;;  %v2036_v7 = vrot.slane %v4013_v4, 1  ;;  %v1711_v1 = vmul.f32 %v4007_v33, %v4007_v33 }
 0x1d6   : > { %v1751_v19 = vsel %vm1630_vm8, %v1710_v8, 0.0  ;;  %2021 = vrot.lane.b32.xlu0 %v2006_v14, %s3048_s8  ;;  %v1902_v61 = vsel %vm1834_vm12, %v1901_v54, %v1900_v39  ;;  %v2033_v6 = vsel %vm1831_vm11, %v2032_v62, %v2031_v10  ;;  %v1750_v59 = vadd.f32 %v4048_v35, %v4155_v58 }
 0x1d7   : > { %v1904_v43 = vsel %vm1837_vm13, %v1903_v5, %v1902_v61  ;;  %v2035_v55 = vsel %vm1834_vm12, %v2034_v52, %v2033_v6  ;;  %v1712_v8 = vmul.f32 %v4038_v37, %v4038_v37  ;;  %v2039_v50 = vrot.slane %v4063_v36, 7 }
 0x1d8   : > { %v1906_v56 = vsel %vm1840_vm14, %v1905_v17, %v1904_v43  ;;  %v2037_v30 = vsel %vm1837_vm13, %v2036_v7, %v2035_v55  ;;  %v1752_v15 = vadd.f32 %v1751_v19, %v1750_v59  ;;  %v1753_v35 = vsel %vm1630_vm8, %v1711_v1, 0.0 }
 0x1d9   : > { %v1908_v22 = vsel %vm1843_vm15, %v1907_v12, %v1906_v56  ;;  %v2341_v58 = vrot.slane %v3917_v51, 7  ;;  %v2342_v16 = vrot.slane %v3931_v26, 6  ;;  %v2344_v20 = vrot.slane %v3950_v25, 5 }
 0x1da   : > { %v4233_v47 = vpop.f32.mrb[26].mxu0  ;;  %1923 = vrot.lane.b32.xlu0 %v1908_v22, %s3049_s9  ;;  %v2038_v32 = vsel %vm1840_vm14, %v4038_v37, %v2037_v30  ;;  %v1754_v54 = vadd.f32 %v1753_v35, %v1752_v15  ;;  %v2346_v5 = vrot.slane %v3968_v49, 4  ;;  %v2348_v17 = vrot.slane %v3987_v13, 3 }
 0x1db   : > { %v4237_v41 = vpop.f32.mrb[27].mxu0  ;;  %v2343_v42 = vsel %vm1825_vm9, %v2342_v16, %v2341_v58  ;;  %v2350_v40 = vrot.slane %v4007_v33, 2  ;;  %v2111_v9 = vrot.slane %v3931_v26, 7  ;;  %v2113_v12 = vrot.slane %v3950_v25, 6 }
 0x1dc   : > { %v2040_v11 = vsel %vm1843_vm15, %v2039_v50, %v2038_v32  ;;  %v2345_v62 = vsel %vm1828_vm10, %v2344_v20, %v2343_v42  ;;  %v2115_v0 = vrot.slane %v3968_v49, 5  ;;  %v2117_v31 = vrot.slane %v3987_v13, 4 }
 0x1dd   : > { %v1755_v24 = vsel %vm1630_vm8, %v1712_v8, 0.0  ;;  %v2347_v52 = vsel %vm1831_vm11, %v2346_v5, %v2345_v62  ;;  %v2112_v14 = vsel %vm1825_vm9, %v2111_v9, %v3917_v51  ;;  %v2119_v39 = vrot.slane %v4007_v33, 3 }
 0x1de   : > { %2055 = vrot.lane.b32.xlu0 %v2040_v11, %s3049_s9  ;;  %v1713_v10 = vmul.f32 %v4028_v3, %v4028_v3  ;;  %v2349_v7 = vsel %vm1834_vm12, %v2348_v17, %v2347_v52  ;;  %v2114_v1 = vsel %vm1828_vm10, %v2113_v12, %v2112_v14  ;;  %v2243_v6 = vrot.slane %v3917_v51, 4 }
 0x1df   : > { %v4266_v19 = vsel %vm1837_vm13, %v2350_v40, %v2349_v7  ;;  %v2116_v61 = vsel %vm1831_vm11, %v2115_v0, %v2114_v1  ;;  %v2244_v43 = vrot.slane %v3931_v26, 3  ;;  %v1756_v59 = vadd.f32 %v1755_v24, %v1754_v54 }
 0x1e0   : > { %v2118_v56 = vsel %vm1834_vm12, %v2117_v31, %v2116_v61  ;;  %v2246_v30 = vrot.slane %v3950_v25, 2  ;;  %v1714_v22 = vmul.f32 %v4063_v36, %v4063_v36  ;;  %v2248_v51 = vrot.slane %v3968_v49, 1 }
 0x1e1   : > { %v4280_v50 = vsel %vm1837_vm13, %v2119_v39, %v2118_v56  ;;  %v2245_v15 = vsel %vm1825_vm9, %v2244_v43, %v2243_v6  ;;  %v2251_v35 = vrot.slane %v4007_v33, 7  ;;  %v1757_v58 = vsel %vm1630_vm8, %v1713_v10, 0.0 }
 0x1e2   : > { %v4271_v55 = vpop.f32.mrb[28].mxu0  ;;  %v2247_v26 = vsel %vm1828_vm10, %v2246_v30, %v2245_v15  ;;  %v1758_v20 = vadd.f32 %v1757_v58, %v1756_v59  ;;  %v1759_v17 = vsel %vm1630_vm8, %v1714_v22, 0.0  ;;  %v4303_v12 = vmul.f32 %v4055_v48, %v4055_v48 }
 0x1e3   : > { %v4275_v8 = vpop.f32.mrb[29].mxu0  ;;  %v2249_v25 = vsel %vm1831_vm11, %v2248_v51, %v2247_v26 }
 0x1e4   : > { %v2250_v32 = vsel %vm1834_vm12, %v3987_v13, %v2249_v25  ;;  %v4305_v13 = vadd.f32 %v1759_v17, %v1758_v20 }
 0x1e5   : > { %v4295_v49 = vsel %vm1837_vm13, %v2251_v35, %v2250_v32 }
 0x1e6   : > { %v2831_v16 = vpop.f32.mrb[16].mxu1 }
 0x1e7   : > { %v4291_v54 = vadd.f32 %v4072_v63, %v2831_v16  ;;  %v1253_v5 = vpop.f32.mrb[17].mxu1 }
 0x1e8   : > { %v4298_v42 = vadd.f32 %v4080_v60, %v1253_v5 }
 0x1e9   : > { %v2155_v9 = vrot.slane %v4291_v54, 1  ;;  %v2223_v62 = vrot.slane %v4291_v54, 3  ;;  %v2287_v0 = vrot.slane %v4291_v54, 5  ;;  %v2189_v60 = vrot.slane %v4291_v54, 2 }
 0x1ea   : > { %v2834_v40 = vpop.f32.mrb[18].mxu1  ;;  %v2075_v52 = vrot.slane %v4298_v42, 7  ;;  %v1943_v14 = vrot.slane %v4298_v42, 3  ;;  %v2321_v39 = vrot.slane %v4291_v54, 6  ;;  %v1875_v61 = vrot.slane %v4298_v42, 1 }
 0x1eb   : > { %v4308_v63 = vadd.f32 %v4096_v34, %v2834_v40  ;;  %v1263_v11 = vpop.f32.mrb[19].mxu1 }
 0x1ec   : > { %v4314_v31 = vadd.f32 %v4105_v53, %v1263_v11  ;;  %v4316_v24 = vpop.f32.mrb[30].mxu0 }
 0x1ed   : > { %v4321_v34 = vpop.f32.mrb[31].mxu0  ;;  %v2224_v10 = vrot.slane %v4308_v63, 2  ;;  %v2288_v7 = vrot.slane %v4308_v63, 4  ;;  %v2190_v1 = vrot.slane %v4308_v63, 1  ;;  %v2156_v43 = vsel %vm1825_vm9, %v4308_v63, %v2155_v9 }
 0x1ee   : > { %v2837_v53 = vpop.f32.mrb[20].mxu1  ;;  %v2076_v6 = vrot.slane %v4314_v31, 6  ;;  %v1944_v59 = vrot.slane %v4314_v31, 2  ;;  %v2322_v56 = vrot.slane %v4308_v63, 5  ;;  %v1876_v26 = vsel %vm1825_vm9, %v4314_v31, %v1875_v61 }
 0x1ef   : > { %v4333_v30 = vadd.f32 %v4124_v38, %v2837_v53  ;;  %v1273_v22 = vpop.f32.mrb[21].mxu1  ;;  %v2225_v15 = vsel %vm1825_vm9, %v2224_v10, %v2223_v62  ;;  %v2191_v51 = vsel %vm1825_vm9, %v2190_v1, %v2189_v60  ;;  %v2289_v25 = vsel %vm1825_vm9, %v2288_v7, %v2287_v0 }
 0x1f0   : > { %v4340_v35 = vadd.f32 %v4131_v57, %v1273_v22  ;;  %v2077_v58 = vsel %vm1825_vm9, %v2076_v6, %v2075_v52  ;;  %v1945_v16 = vsel %vm1825_vm9, %v1944_v59, %v1943_v14  ;;  %v2323_v5 = vsel %vm1825_vm9, %v2322_v56, %v2321_v39 }
 0x1f1   : > { %v2157_v38 = vrot.slane %v4333_v30, 7  ;;  %v2226_v20 = vrot.slane %v4333_v30, 1  ;;  %v2290_v32 = vrot.slane %v4333_v30, 3  ;;  %v2192_v9 = vsel %vm1828_vm10, %v4333_v30, %v2191_v51 }
 0x1f2   : > { %v2840_v17 = vpop.f32.mrb[22].mxu1  ;;  %v2078_v40 = vrot.slane %v4340_v35, 5  ;;  %v1946_v57 = vrot.slane %v4340_v35, 1  ;;  %v2324_v11 = vrot.slane %v4333_v30, 4  ;;  %v1877_v14 = vrot.slane %v4340_v35, 7 }
 0x1f3   : > { %v4355_v62 = vadd.f32 %v4149_v27, %v2840_v17  ;;  %v1283_v0 = vpop.f32.mrb[23].mxu1  ;;  %v2158_v60 = vsel %vm1828_vm10, %v2157_v38, %v2156_v43  ;;  %v2227_v52 = vsel %vm1828_vm10, %v2226_v20, %v2225_v15  ;;  %v2291_v7 = vsel %vm1828_vm10, %v2290_v32, %v2289_v25 }
 0x1f4   : > { %v4361_v39 = vadd.f32 %v4158_v28, %v1283_v0  ;;  %v2079_v10 = vsel %vm1828_vm10, %v2078_v40, %v2077_v58  ;;  %v1947_v1 = vsel %vm1828_vm10, %v1946_v57, %v1945_v16  ;;  %v2325_v6 = vsel %vm1828_vm10, %v2324_v11, %v2323_v5 }
 0x1f5   : > { %v2159_v61 = vrot.slane %v4355_v62, 6  ;;  %v2292_v27 = vrot.slane %v4355_v62, 2  ;;  %v2193_v53 = vrot.slane %v4355_v62, 7  ;;  %v2228_v28 = vsel %vm1831_vm11, %v4355_v62, %v2227_v52 }
 0x1f6   : > { %v2843_v43 = vpop.f32.mrb[24].mxu1  ;;  %v2080_v59 = vrot.slane %v4361_v39, 4  ;;  %v1948_v56 = vsel %vm1831_vm11, %v4361_v39, %v1947_v1  ;;  %v2326_v22 = vrot.slane %v4355_v62, 3  ;;  %v4382_v16 = vsel %vm1828_vm10, %v1877_v14, %v1876_v26 }
 0x1f7   : > { %v4377_v15 = vadd.f32 %v4192_v46, %v2843_v43  ;;  %v1293_v51 = vpop.f32.mrb[25].mxu1  ;;  %v2160_v58 = vsel %vm1831_vm11, %v2159_v61, %v2158_v60  ;;  %v2293_v25 = vsel %vm1831_vm11, %v2292_v27, %v2291_v7  ;;  %v2194_v32 = vsel %vm1831_vm11, %v2193_v53, %v2192_v9 }
 0x1f8   : > { %v4385_v38 = vadd.f32 %v4198_v29, %v1293_v51  ;;  %v2081_v20 = vsel %vm1831_vm11, %v2080_v59, %v2079_v10  ;;  %v2327_v5 = vsel %vm1831_vm11, %v2326_v22, %v2325_v6  ;;  %v1879_v60 = vrot.slane %v4361_v39, 6 }
 0x1f9   : > { %v2161_v46 = vrot.slane %v4377_v15, 5  ;;  %v2229_v17 = vrot.slane %v4377_v15, 7  ;;  %v2294_v40 = vrot.slane %v4377_v15, 1  ;;  %v2195_v57 = vrot.slane %v4377_v15, 6 }
 0x1fa   : > { %v2846_v11 = vpop.f32.mrb[26].mxu1  ;;  %v2082_v26 = vrot.slane %v4385_v38, 3  ;;  %v1949_v29 = vrot.slane %v4385_v38, 7  ;;  %v2328_v0 = vrot.slane %v4377_v15, 2 }
 0x1fb   : > { %v4399_v9 = vadd.f32 %v4233_v47, %v2846_v11  ;;  %v1303_v52 = vpop.f32.mrb[27].mxu1  ;;  %v2162_v14 = vsel %vm1834_vm12, %v2161_v46, %v2160_v58  ;;  %v2230_v10 = vsel %vm1834_vm12, %v2229_v17, %v2228_v28  ;;  %v2295_v7 = vsel %vm1834_vm12, %v2294_v40, %v2293_v25 }
 0x1fc   : > { %v4405_v1 = vadd.f32 %v4237_v41, %v1303_v52  ;;  %v2083_v61 = vsel %vm1834_vm12, %v2082_v26, %v2081_v20  ;;  %v1950_v27 = vsel %vm1834_vm12, %v1949_v29, %v1948_v56  ;;  %v2196_v53 = vsel %vm1834_vm12, %v2195_v57, %v2194_v32 }
 0x1fd   : > { %v2163_v6 = vrot.slane %v4399_v9, 4  ;;  %v2231_v47 = vrot.slane %v4399_v9, 6  ;;  %v2296_v43 = vsel %vm1837_vm13, %v4399_v9, %v2295_v7  ;;  %v2197_v59 = vrot.slane %v4399_v9, 5 }
 0x1fe   : > { %v2849_v28 = vpop.f32.mrb[28].mxu1  ;;  %v2084_v22 = vrot.slane %v4405_v1, 2  ;;  %v1951_v41 = vrot.slane %v4405_v1, 6  ;;  %v2329_v51 = vsel %vm1834_vm12, %v2328_v0, %v2327_v5  ;;  %v2330_v56 = vrot.slane %v4399_v9, 1 }
 0x1ff   : > { %v4420_v58 = vadd.f32 %v4271_v55, %v2849_v28  ;;  %v1313_v25 = vpop.f32.mrb[29].mxu1  ;;  %v2164_v20 = vsel %vm1837_vm13, %v2163_v6, %v2162_v14  ;;  %v2232_v32 = vsel %vm1837_vm13, %v2231_v47, %v2230_v10  ;;  %v2198_v46 = vsel %vm1837_vm13, %v2197_v59, %v2196_v53 }
 0x200   : > { %v4426_v17 = vadd.f32 %v4275_v8, %v1313_v25  ;;  %v2085_v40 = vsel %vm1837_vm13, %v2084_v22, %v2083_v61  ;;  %v1952_v57 = vsel %vm1837_vm13, %v1951_v41, %v1950_v27  ;;  %v2331_v5 = vsel %vm1837_vm13, %v2330_v56, %v2329_v51 }
 0x201   : > { %v2165_v11 = vrot.slane %v4420_v58, 3  ;;  %v2233_v55 = vrot.slane %v4420_v58, 5  ;;  %v2297_v26 = vrot.slane %v4420_v58, 7  ;;  %v2199_v29 = vrot.slane %v4420_v58, 4 }
 0x202   : > { %v2852_v0 = vpop.f32.mrb[30].mxu1  ;;  %v2086_v52 = vrot.slane %v4426_v17, 1  ;;  %v1953_v8 = vrot.slane %v4426_v17, 5  ;;  %v2332_v14 = vsel %vm1840_vm14, %v4420_v58, %v2331_v5  ;;  %v1881_v10 = vrot.slane %v4385_v38, 5 }
 0x203   : > { %v4441_v7 = vadd.f32 %v4316_v24, %v2852_v0  ;;  %v1323_v61 = vpop.f32.mrb[31].mxu1  ;;  %v2166_v27 = vsel %vm1840_vm14, %v2165_v11, %v2164_v20  ;;  %v2234_v53 = vsel %vm1840_vm14, %v2233_v55, %v2232_v32  ;;  %v2298_v6 = vsel %vm1840_vm14, %v2297_v26, %v2296_v43 }
 0x204   : > { %v4447_v47 = vadd.f32 %v4321_v34, %v1323_v61  ;;  %v2087_v59 = vsel %vm1840_vm14, %v2086_v52, %v2085_v40  ;;  %v1954_v28 = vsel %vm1840_vm14, %v1953_v8, %v1952_v57  ;;  %v2200_v22 = vsel %vm1840_vm14, %v2199_v29, %v2198_v46 }
 0x205   : > { %v2167_v41 = vrot.slane %v4441_v7, 2  ;;  %v2235_v24 = vrot.slane %v4441_v7, 4  ;;  %v2299_v51 = vrot.slane %v4441_v7, 6  ;;  %v2201_v56 = vrot.slane %v4441_v7, 3 }
 0x206   : > { %v2088_v43 = vsel %vm1843_vm15, %v4447_v47, %v2087_v59  ;;  %v1955_v34 = vrot.slane %v4447_v47, 4  ;;  %v2333_v25 = vrot.slane %v4441_v7, 7  ;;  %v1880_v20 = vsel %vm1831_vm11, %v1879_v60, %v4382_v16 }
 0x207   : > { %2091 = vrot.lane.b32.xlu0 %v2088_v43, %s3047_s7  ;;  %v2168_v32 = vsel %vm1843_vm15, %v2167_v41, %v2166_v27  ;;  %v2236_v46 = vsel %vm1843_vm15, %v2235_v24, %v2234_v53  ;;  %v2300_v40 = vsel %vm1843_vm15, %v2299_v51, %v2298_v6  ;;  %v2202_v57 = vsel %vm1843_vm15, %v2201_v56, %v2200_v22 }
 0x208   : > { %2171 = vrot.lane.b32.xlu1 %v2168_v32, %s3048_s8  ;;  %v1956_v5 = vsel %vm1843_vm15, %v1955_v34, %v1954_v28  ;;  %v2334_v11 = vsel %vm1843_vm15, %v2333_v25, %v2332_v14  ;;  %v1883_v55 = vrot.slane %v4405_v1, 4  ;;  %v1885_v16 = vrot.slane %v4426_v17, 3 }
 0x209   : > { %v1882_v60 = vsel %vm1834_vm12, %v1881_v10, %v1880_v20  ;;  %v1887_v26 = vrot.slane %v4447_v47, 2  ;;  %v1716_v29 = vmul.f32 %v4298_v42, %v4298_v42  ;;  %v1761_v0 = vsel %vm1630_vm8, %v4303_v12, 0.0 }
 0x20a   : > { %v1884_v52 = vsel %vm1837_vm13, %v1883_v55, %v1882_v60  ;;  %v1762_v8 = vadd.f32 %v1761_v0, %v4305_v13  ;;  %v1717_v10 = vmul.f32 %v4291_v54, %v4291_v54  ;;  %v1718_v27 = vmul.f32 %v4314_v31, %v4314_v31 }
 0x20b   : > { %2239 = vrot.lane.b32.xlu0 %v2236_v46, %s3047_s7  ;;  %v1886_v61 = vsel %vm1840_vm14, %v1885_v16, %v1884_v52  ;;  %v2007_v53 = vrot.slane %v4298_v42, 5  ;;  %v1719_v13 = vmul.f32 %v4308_v63, %v4308_v63  ;;  %v1720_v6 = vmul.f32 %v4340_v35, %v4340_v35 }
 0x20c   : > { %2303 = vrot.lane.b32.xlu1 %v2300_v40, %s3048_s8  ;;  %v1888_v12 = vsel %vm1843_vm15, %v1887_v26, %v1886_v61  ;;  %v1721_v59 = vmul.f32 %v4333_v30, %v4333_v30  ;;  %v1722_v28 = vmul.f32 %v4361_v39, %v4361_v39  ;;  %v1723_v22 = vmul.f32 %v4355_v62, %v4355_v62 }
 0x20d   : > { %v1724_v41 = vmul.f32 %v4385_v38, %v4385_v38  ;;  %v1763_v24 = vsel %vm1630_vm8, %v1716_v29, 0.0  ;;  %v2355_v56 = vrot.slane %v4291_v54, 7  ;;  %v1909_v43 = vrot.slane %v4298_v42, 2 }
 0x20e   : > { %v1764_v51 = vadd.f32 %v1763_v24, %v1762_v8  ;;  %v2041_v34 = vrot.slane %v4298_v42, 6  ;;  %v4509_v25 = vmul.f32 %v4377_v15, %v4377_v15  ;;  %v4513_v20 = vmul.f32 %v4405_v1, %v4405_v1 }
 0x20f   : > { %1959 = vrot.lane.b32.xlu0 %v1956_v5, %s3047_s7  ;;  %v1765_v32 = vsel %vm1630_vm8, %v1717_v10, 0.0  ;;  %v1767_v46 = vsel %vm1630_vm8, %v1718_v27, 0.0  ;;  %v4520_v40 = vmul.f32 %v4399_v9, %v4399_v9  ;;  %v1769_v5 = vsel %vm1630_vm8, %v1719_v13, 0.0 }
 0x210   : > { %2205 = vrot.lane.b32.xlu1 %v2202_v57, %s3049_s9  ;;  %v1766_v55 = vadd.f32 %v1765_v32, %v1764_v51  ;;  %v1771_v16 = vsel %vm1630_vm8, %v1720_v6, 0.0  ;;  %v1773_v60 = vsel %vm1630_vm8, %v1721_v59, 0.0  ;;  %v1775_v26 = vsel %vm1630_vm8, %v1722_v28, 0.0 }
 0x211   : > { %v1777_v29 = vsel %vm1630_vm8, %v1723_v22, 0.0  ;;  %v1779_v0 = vsel %vm1630_vm8, %v1724_v41, 0.0  ;;  %v2008_v57 = vrot.slane %v4314_v31, 4  ;;  %v2010_v8 = vrot.slane %v4340_v35, 3 }
 0x212   : > { %v1768_v52 = vadd.f32 %v1767_v46, %v1766_v55  ;;  %v2012_v61 = vrot.slane %v4361_v39, 2  ;;  %v2014_v10 = vrot.slane %v4385_v38, 1  ;;  %v2017_v27 = vrot.slane %v4426_v17, 7 }
 0x213   : > { %v2019_v13 = vrot.slane %v4447_v47, 6  ;;  %v2356_v6 = vrot.slane %v4308_v63, 6  ;;  %v2009_v28 = vsel %vm1825_vm9, %v2008_v57, %v2007_v53  ;;  %v2358_v22 = vrot.slane %v4333_v30, 5 }
 0x214   : > { %2337 = vrot.lane.b32.xlu1 %v2334_v11, %s3049_s9  ;;  %v1770_v59 = vadd.f32 %v1769_v5, %v1768_v52  ;;  %v2360_v41 = vrot.slane %v4355_v62, 4  ;;  %v2011_v24 = vsel %vm1828_vm10, %v2010_v8, %v2009_v28  ;;  %v2362_v32 = vrot.slane %v4377_v15, 3 }
 0x215   : > { %v2357_v51 = vsel %vm1825_vm9, %v2356_v6, %v2355_v56  ;;  %v2364_v46 = vrot.slane %v4399_v9, 2  ;;  %v2013_v14 = vsel %vm1831_vm11, %v2012_v61, %v2011_v24  ;;  %v2366_v5 = vrot.slane %v4420_v58, 1 }
 0x216   : > { %v1772_v55 = vadd.f32 %v1771_v16, %v1770_v59  ;;  %v2359_v11 = vsel %vm1828_vm10, %v2358_v22, %v2357_v51  ;;  %v2015_v53 = vsel %vm1834_vm12, %v2014_v10, %v2013_v14  ;;  %v1910_v57 = vrot.slane %v4314_v31, 1 }
 0x217   : > { %v2361_v52 = vsel %vm1831_vm11, %v2360_v41, %v2359_v11  ;;  %v1913_v8 = vrot.slane %v4361_v39, 7  ;;  %v2016_v16 = vsel %vm1837_vm13, %v4405_v1, %v2015_v53  ;;  %v1915_v6 = vrot.slane %v4385_v38, 6 }
 0x218   : > { %1891 = vrot.lane.b32.xlu1 %v1888_v12, %s3048_s8  ;;  %v1774_v56 = vadd.f32 %v1773_v60, %v1772_v55  ;;  %v2363_v61 = vsel %vm1834_vm12, %v2362_v32, %v2361_v52  ;;  %v2018_v59 = vsel %vm1840_vm14, %v2017_v27, %v2016_v16  ;;  %v1911_v10 = vsel %vm1825_vm9, %v1910_v57, %v1909_v43 }
 0x219   : > { %v2365_v14 = vsel %vm1837_vm13, %v2364_v46, %v2363_v61  ;;  %v1917_v28 = vrot.slane %v4405_v1, 5  ;;  %v2020_v41 = vsel %vm1843_vm15, %v2019_v13, %v2018_v59  ;;  %v1912_v60 = vsel %vm1828_vm10, %v4340_v35, %v1911_v10 }
 0x21a   : > { %v1776_v22 = vadd.f32 %v1775_v26, %v1774_v56  ;;  %v2367_v12 = vsel %vm1840_vm14, %v2366_v5, %v2365_v14  ;;  %v1914_v27 = vsel %vm1831_vm11, %v1913_v8, %v1912_v60  ;;  %v1919_v51 = vrot.slane %v4426_v17, 4 }
 0x21b   : > { %v4565_v24 = vsel %vm1843_vm15, %v4441_v7, %v2367_v12  ;;  %v1921_v43 = vrot.slane %v4447_v47, 3  ;;  %v1916_v26 = vsel %vm1834_vm12, %v1915_v6, %v1914_v27  ;;  %v2042_v13 = vrot.slane %v4314_v31, 5 }
 0x21c   : > { %v1778_v32 = vadd.f32 %v1777_v29, %v1776_v22  ;;  %2023 = vrot.lane.b32.xlu1 %v2020_v41, %s3048_s8  ;;  %v2044_v46 = vrot.slane %v4340_v35, 4  ;;  %v1728_v55 = vmul.f32 %v4426_v17, %v4426_v17  ;;  %v1918_v11 = vsel %vm1837_vm13, %v1917_v28, %v1916_v26 }
 0x21d   : > { %v2046_v5 = vrot.slane %v4361_v39, 3  ;;  %v2048_v53 = vrot.slane %v4385_v38, 2  ;;  %v1920_v29 = vsel %vm1840_vm14, %v1919_v51, %v1918_v11  ;;  %v2043_v57 = vsel %vm1825_vm9, %v2042_v13, %v2041_v34 }
 0x21e   : > { %v1780_v52 = vadd.f32 %v1779_v0, %v1778_v32  ;;  %v2050_v8 = vrot.slane %v4405_v1, 1  ;;  %v1781_v56 = vsel %vm1630_vm8, %v4509_v25, 0.0  ;;  %v1783_v16 = vsel %vm1630_vm8, %v4513_v20, 0.0 }
 0x21f   : > { %v1922_v61 = vsel %vm1843_vm15, %v1921_v43, %v1920_v29  ;;  %v2045_v6 = vsel %vm1828_vm10, %v2044_v46, %v2043_v57  ;;  %v2053_v14 = vrot.slane %v4447_v47, 7  ;;  %v1650_v34 = vsel %vm1630_vm8, %v4013_v4, 0.0 }
 0x220   : > { %v1782_v59 = vadd.f32 %v1781_v56, %v1780_v52  ;;  %1925 = vrot.lane.b32.xlu1 %v1922_v61, %s3049_s9  ;;  %v2047_v0 = vsel %vm1831_vm11, %v2046_v5, %v2045_v6  ;;  %v1729_v25 = vmul.f32 %v4420_v58, %v4420_v58  ;;  %v4879_v22 = vrot.slane %v4028_v3, 1 }
 0x221   : > { %v2049_v10 = vsel %vm1834_vm12, %v2048_v53, %v2047_v0  ;;  %v1730_v12 = vmul.f32 %v4447_v47, %v4447_v47  ;;  %v1785_v60 = vsel %vm1630_vm8, %v4520_v40, 0.0  ;;  %v1787_v27 = vsel %vm1630_vm8, %v1728_v55, 0.0 }
 0x222   : > { %v1784_v20 = vadd.f32 %v1783_v16, %v1782_v59  ;;  %v2051_v28 = vsel %vm1837_vm13, %v2050_v8, %v2049_v10  ;;  %v2353_v41 = vsel %vm1840_vm14, %v4879_v22, %v4266_v19  ;;  %v1652_v26 = vsel %vm1630_vm8, %v4007_v33, 0.0 }
 0x223   : > { %v2052_v51 = vsel %vm1840_vm14, %v4426_v17, %v2051_v28  ;;  %v1651_v13 = vadd.f32 %v1650_v34, %v4017_v21  ;;  %v4616_v19 = vsel %vm1630_vm8, %v4038_v37, 0.0  ;;  %v2354_v40 = vsel %vm1843_vm15, %v4055_v48, %v2353_v41 }
 0x224   : > { %v1786_v43 = vadd.f32 %v1785_v60, %v1784_v20  ;;  %v2054_v32 = vsel %vm1843_vm15, %v2053_v14, %v2052_v51  ;;  %v1731_v46 = vmul.f32 %v4441_v7, %v4441_v7  ;;  %v2125_v11 = vrot.slane %v4308_v63, 7 }
 0x225   : > { %2057 = vrot.lane.b32.xlu1 %v2054_v32, %s3049_s9  ;;  %v2127_v5 = vrot.slane %v4333_v30, 6  ;;  %v1789_v33 = vsel %vm1630_vm8, %v1729_v25, 0.0  ;;  %v1791_v21 = vsel %vm1630_vm8, %v1730_v12, 0.0  ;;  %v2129_v53 = vrot.slane %v4355_v62, 5 }
 0x226   : > { %v1788_v55 = vadd.f32 %v1787_v27, %v1786_v43  ;;  %v2131_v52 = vrot.slane %v4377_v15, 4  ;;  %v2253_v57 = vrot.slane %v4028_v3, 6  ;;  %v2126_v8 = vsel %vm1825_vm9, %v2125_v11, %v4291_v54 }
 0x227   : > { %v2133_v56 = vrot.slane %v4399_v9, 3  ;;  %v2255_v16 = vrot.slane %v4055_v48, 5  ;;  %v2128_v61 = vsel %vm1828_vm10, %v2127_v5, %v2126_v8  ;;  %v2135_v6 = vrot.slane %v4420_v58, 2 }
 0x228   : > { %v1790_v29 = vadd.f32 %v1789_v33, %v1788_v55  ;;  %v2137_v59 = vrot.slane %v4441_v7, 1  ;;  %v2130_v14 = vsel %vm1831_vm11, %v2129_v53, %v2128_v61  ;;  %v2257_v34 = vrot.slane %v4291_v54, 4 }
 0x229   : > { %2369 = vrot.lane.b32.xlu1 %v2354_v40, %s3047_s7  ;;  %v2258_v10 = vrot.slane %v4308_v63, 3  ;;  %v1793_v25 = vsel %vm1630_vm8, %v1731_v46, 0.0  ;;  %v2132_v20 = vsel %vm1834_vm12, %v2131_v52, %v2130_v14  ;;  %v2260_v28 = vrot.slane %v4333_v30, 2 }
 0x22a   : > { %v1792_v0 = vadd.f32 %v1791_v21, %v1790_v29  ;;  %v2262_v22 = vrot.slane %v4355_v62, 1  ;;  %v2134_v12 = vsel %vm1837_vm13, %v2133_v56, %v2132_v20  ;;  %v2265_v27 = vrot.slane %v4399_v9, 7 }
 0x22b   : > { %v2259_v60 = vsel %vm1825_vm9, %v2258_v10, %v2257_v34  ;;  %v2136_v51 = vsel %vm1840_vm14, %v2135_v6, %v2134_v12  ;;  %v2267_v32 = vrot.slane %v4420_v58, 6  ;;  %v2269_v40 = vrot.slane %v4441_v7, 5 }
 0x22c   : > { %v1794_v41 = vadd.f32 %v1793_v25, %v1792_v0  ;;  %v2261_v43 = vsel %vm1828_vm10, %v2260_v28, %v2259_v60  ;;  %v4653_v55 = vsel %vm1843_vm15, %v2137_v59, %v2136_v51  ;;  %v1845_v5 = vrot.slane %v4314_v31, 7 }
 0x22d   : > { %v2263_v11 = vsel %vm1831_vm11, %v2262_v22, %v2261_v43  ;;  %v1847_v21 = vrot.slane %v4340_v35, 6  ;;  %v1849_v53 = vrot.slane %v4361_v39, 5  ;;  %v1851_v52 = vrot.slane %v4385_v38, 4 }
 0x22e   : > { %v1795_v46 = vrot.slane %v1794_v41, 4  ;;  %v2264_v33 = vsel %vm1834_vm12, %v4377_v15, %v2263_v11  ;;  %v1846_v56 = vsel %vm1825_vm9, %v1845_v5, %v4298_v42  ;;  %v1853_v61 = vrot.slane %v4405_v1, 3 }
 0x22f   : > { %v2266_v8 = vsel %vm1837_vm13, %v2265_v27, %v2264_v33  ;;  %v1848_v59 = vsel %vm1828_vm10, %v1847_v21, %v1846_v56  ;;  %v1855_v0 = vrot.slane %v4426_v17, 2  ;;  %v1857_v14 = vrot.slane %v4447_v47, 1 }
 0x230   : > { %v1796_v29 = vadd.f32 %v1795_v46, %v1794_v41  ;;  %v2268_v6 = vsel %vm1840_vm14, %v2267_v32, %v2266_v8  ;;  %v1850_v20 = vsel %vm1831_vm11, %v1849_v53, %v1848_v59  ;;  %v1653_v28 = vadd.f32 %v1652_v26, %v1651_v13 }
 0x231   : > { %v4671_v25 = vsel %vm1843_vm15, %v2269_v40, %v2268_v6  ;;  %v2121_v22 = vrot.slane %v4028_v3, 2  ;;  %v1852_v41 = vsel %vm1834_vm12, %v1851_v52, %v1850_v20  ;;  %v2123_v60 = vrot.slane %v4055_v48, 1 }
 0x232   : > { %v1797_v34 = vrot.slane %v1796_v29, 2  ;;  %v2170_v10 = vpop.permute.xlu0 %2169  ;;  %v1854_v27 = vsel %vm1837_vm13, %v1853_v61, %v1852_v41  ;;  %v1655_v51 = vadd.f32 %v4616_v19, %v1653_v28  ;;  %v2254_v43 = vsel %vm1840_vm14, %v2253_v57, %v4295_v49  ;;  %v4691_v57 = vpop.permute.xlu1 %2089 }
 0x233   : > { %v1856_v32 = vsel %vm1840_vm14, %v1855_v0, %v1854_v27  ;;  %v1656_v40 = vsel %vm1630_vm8, %v4028_v3, 0.0  ;;  %v1658_v26 = vsel %vm1630_vm8, %v4063_v36, 0.0  ;;  %v2256_v46 = vsel %vm1843_vm15, %v2255_v16, %v2254_v43 }
 0x234   : > { %v1798_v12 = vadd.f32 %v1797_v34, %v1796_v29  ;;  %v4688_v5 = vsel %vm1843_vm15, %v1857_v14, %v1856_v32  ;;  %v1657_v19 = vadd.f32 %v1656_v40, %v1655_v51  ;;  %v2122_v3 = vsel %vm1840_vm14, %v2121_v22, %v4280_v50 }
 0x235   : > { %v1660_v53 = vsel %vm1630_vm8, %v4055_v48, 0.0  ;;  %v1662_v16 = vsel %vm1630_vm8, %v4298_v42, 0.0  ;;  %v2124_v52 = vsel %vm1843_vm15, %v2123_v60, %v2122_v3  ;;  %v1977_v8 = vrot.slane %v4298_v42, 4 }
 0x236   : > { %v1799_v13 = vrot.slane %v1798_v12, 1  ;;  %v2302_v11 = vpop.permute.xlu0 %2301  ;;  %v1659_v21 = vadd.f32 %v1658_v26, %v1657_v19  ;;  %v1978_v56 = vrot.slane %v4314_v31, 3  ;;  %v1980_v61 = vrot.slane %v4340_v35, 2 }
 0x237   : > { %v2395_v33 = vsel %vm1630_vm8, %v2256_v46, %v2302_v11  ;;  %v2389_v50 = vsel %vm1630_vm8, %v2124_v52, %v2170_v10  ;;  %v1982_v6 = vrot.slane %v4361_v39, 1  ;;  %v1664_v42 = vsel %vm1630_vm8, %v4291_v54, 0.0  ;;  %v2238_v10 = vpop.permute.xlu1 %2237 }
 0x238   : > { %v1800_v49 = vadd.f32 %v1799_v13, %v1798_v12  ;;  %v1661_v29 = vadd.f32 %v1660_v53, %v1659_v21  ;;  %v1666_v0 = vsel %vm1630_vm8, %v4314_v31, 0.0  ;;  %v1979_v14 = vsel %vm1825_vm9, %v1978_v56, %v1977_v8 }
 0x239   : > { %v1985_v34 = vrot.slane %v4405_v1, 7  ;;  %v1981_v22 = vsel %vm1828_vm10, %v1980_v61, %v1979_v14  ;;  %v1987_v41 = vrot.slane %v4426_v17, 6  ;;  %v1989_v31 = vrot.slane %v4447_v47, 5 }
 0x23a   : > { %1802 = vrot.lane.b32.xlu0 %v1800_v49, %s3048_s8  ;;  %v1663_v48 = vadd.f32 %v1662_v16, %v1661_v29  ;;  %v1983_v12 = vsel %vm1831_vm11, %v1982_v6, %v1981_v22  ;;  %v1824_v60 = vrot.slane %v3938_v45, 7  ;;  %v1668_v43 = vsel %vm1630_vm8, %v4308_v63, 0.0 }
 0x23b   : > { %v1670_v32 = vsel %vm1630_vm8, %v4340_v35, 0.0  ;;  %v1827_v11 = vrot.slane %v3955_v2, 6  ;;  %v1830_v63 = vrot.slane %v3974_v44, 5  ;;  %v1964_v35 = vrot.slane %v3938_v45, 3 }
 0x23c   : > { %v2204_v59 = vpop.permute.xlu0 %2203  ;;  %v1665_v28 = vadd.f32 %v1664_v42, %v1663_v48  ;;  %v1826_v49 = vsel %vm1825_vm9, %v1824_v60, %v3919_v23  ;;  %v1833_v3 = vrot.slane %v3994_v18, 4  ;;  %v1966_v53 = vrot.slane %v3955_v2, 2  ;;  %v1958_v60 = vpop.permute.xlu1 %1957 }
 0x23d   : > { %v2391_v20 = vsel %vm2377_vm0, %v2389_v50, %v2204_v59  ;;  %v1672_v16 = vsel %vm1630_vm8, %v4333_v30, 0.0  ;;  %v1674_v52 = vsel %vm1630_vm8, %v4361_v39, 0.0  ;;  %v1836_v29 = vrot.slane %v4013_v4, 3 }
 0x23e   : > { %2371 = vrot.lane.b32.xlu0 %v4565_v24, %s3047_s7  ;;  %v2393_v54 = vsel %vm2380_vm1, %v2391_v20, %v2238_v10  ;;  %v1667_v27 = vadd.f32 %v1666_v0, %v1665_v28  ;;  %v1984_v24 = vsel %vm1834_vm12, %v4385_v38, %v1983_v12  ;;  %v1963_v8 = vrot.slane %v3919_v23, 4 }
 0x23f   : > { %2403 = vst [vmem:[%s4710_s17 + $0x10] sm:$0xff] %v2393_v54  ;;  %v1986_v40 = vsel %vm1837_vm13, %v1985_v34, %v1984_v24  ;;  %v1968_v56 = vrot.slane %v3974_v44, 1  ;;  %v1829_v45 = vsel %vm1828_vm10, %v1827_v11, %v1826_v49  ;;  %v1839_v50 = vrot.slane %v4038_v37, 2 }
 0x240   : > { %v2336_v51 = vpop.permute.xlu0 %2335  ;;  %v1669_v13 = vadd.f32 %v1668_v43, %v1667_v27  ;;  %v1988_v46 = vsel %vm1840_vm14, %v1987_v41, %v1986_v40  ;;  %v1832_v48 = vsel %vm1831_vm11, %v1830_v63, %v1829_v45  ;;  %v1842_v2 = vrot.slane %v4063_v36, 1 }
 0x241   : > { %v4736_v26 = vsel %vm2377_vm0, %v2395_v33, %v2336_v51  ;;  %v4741_v19 = vsel %vm1843_vm15, %v1989_v31, %v1988_v46  ;;  %v1965_v30 = vsel %vm1825_vm9, %v1964_v35, %v1963_v8  ;;  %v1835_v39 = vsel %vm1834_vm12, %v1833_v3, %v1832_v48 }
 0x242   : > { %v1671_v21 = vadd.f32 %v1670_v32, %v1669_v13  ;;  %v1967_v59 = vsel %vm1828_vm10, %v1966_v53, %v1965_v30  ;;  %v1676_v23 = vsel %vm1630_vm8, %v4355_v62, 0.0  ;;  %v1678_v44 = vsel %vm1630_vm8, %v4385_v38, 0.0 }
 0x243   : > { %v1838_v0 = vsel %vm1837_vm13, %v1836_v29, %v1835_v39  ;;  %v1969_v14 = vsel %vm1831_vm11, %v1968_v56, %v1967_v59  ;;  %v1971_v34 = vrot.slane %v4013_v4, 7  ;;  %v1973_v28 = vrot.slane %v4038_v37, 6 }
 0x244   : > { %v1890_v33 = vpop.permute.xlu0 %1889  ;;  %v1673_v61 = vadd.f32 %v1672_v16, %v1671_v21  ;;  %v1841_v20 = vsel %vm1840_vm14, %v1839_v50, %v1838_v0  ;;  %v1975_v41 = vrot.slane %v4063_v36, 5  ;;  %v1970_v38 = vsel %vm1834_vm12, %v3994_v18, %v1969_v14 }
 0x245   : > { %v1844_v22 = vsel %vm1843_vm15, %v1842_v2, %v1841_v20  ;;  %v1680_v4 = vsel %vm1630_vm8, %v4377_v15, 0.0  ;;  %v1682_v31 = vsel %vm1630_vm8, %v4405_v1, 0.0  ;;  %v1972_v37 = vsel %vm1837_vm13, %v1971_v34, %v1970_v38 }
 0x246   : > { %v1675_v6 = vadd.f32 %v1674_v52, %v1673_v61  ;;  %v2375_v54 = vsel %vm1630_vm8, %v1844_v22, %v1890_v33  ;;  %v1974_v24 = vsel %vm1840_vm14, %v1973_v28, %v1972_v37  ;;  %v1684_v1 = vsel %vm1630_vm8, %v4399_v9, 0.0 }
 0x247   : > { %v1976_v18 = vsel %vm1843_vm15, %v1975_v41, %v1974_v24  ;;  %v1686_v40 = vsel %vm1630_vm8, %v4426_v17, 0.0  ;;  %v1688_v63 = vsel %vm1630_vm8, %v4420_v58, 0.0  ;;  %v1690_v35 = vsel %vm1630_vm8, %v4447_v47, 0.0 }
 0x248   : > { %v2022_v42 = vpop.permute.xlu0 %2021  ;;  %v1677_v10 = vadd.f32 %v1676_v23, %v1675_v6  ;;  %v1692_v17 = vsel %vm1630_vm8, %v4441_v7, 0.0 }
 0x249   : > { %v2383_v15 = vsel %vm1630_vm8, %v1976_v18, %v2022_v42 }
 0x24a   : > { %v1679_v62 = vadd.f32 %v1678_v44, %v1677_v10 }
 0x24c   : > { %v1924_v12 = vpop.permute.xlu0 %1923  ;;  %v1681_v36 = vadd.f32 %v1680_v4, %v1679_v62 }
 0x24d   : > { %v2378_v27 = vsel %vm2377_vm0, %v2375_v54, %v1924_v12 }
 0x24e   : > { %v2381_v51 = vsel %vm2380_vm1, %v2378_v27, %v1958_v60  ;;  %v1683_v43 = vadd.f32 %v1682_v31, %v1681_v36 }
 0x24f   : > { %2401 = vst [vmem:[%s4710_s17] sm:$0xff] %v2381_v51 }
 0x250   : > { %v2056_v32 = vpop.permute.xlu0 %2055  ;;  %v1685_v46 = vadd.f32 %v1684_v1, %v1683_v43 }
 0x251   : > { %v2385_v13 = vsel %vm2377_vm0, %v2383_v15, %v2056_v32 }
 0x252   : > { %v2387_v11 = vsel %vm2380_vm1, %v2385_v13, %v4691_v57  ;;  %v1687_v49 = vadd.f32 %v1686_v40, %v1685_v46 }
 0x253   : > { %2402 = vst [vmem:[%s4710_s17 + $0x8] sm:$0xff] %v2387_v11 }
 0x254   : > { %v1689_v21 = vadd.f32 %v1688_v63, %v1687_v49 }
 0x256   : > { %v1691_v9 = vadd.f32 %v1690_v35, %v1689_v21 }
 0x258   : > { %v1693_v3 = vadd.f32 %v1692_v17, %v1691_v9 }
 0x25a   : > { %v1694_v2 = vrot.slane %v1693_v3, 4 }
 0x25c   : > { %v1695_v42 = vadd.f32 %v1694_v2, %v1693_v3 }
 0x25e   : > { %v1696_v44 = vrot.slane %v1695_v42, 2 }
 0x260   : > { %v1697_v0 = vadd.f32 %v1696_v44, %v1695_v42 }
 0x262   : > { %v1698_v14 = vrot.slane %v1697_v0, 1 }
 0x279   : > { %v2092_v53 = vpop.permute.xlu0 %2091 }
 0x27a   : > { %v2172_v33 = vpop.permute.xlu1 %2171 }
 0x27b   : > { %v2390_v57 = vsel %vm1630_vm8, %v4653_v55, %v2172_v33 }
 0x27d   : > { %v2240_v29 = vpop.permute.xlu0 %2239 }
 0x27e   : > { %v2304_v16 = vpop.permute.xlu1 %2303 }
 0x27f   : > { %v2396_v20 = vsel %vm1630_vm8, %v4671_v25, %v2304_v16 }
 0x281   : > { %v1960_v50 = vpop.permute.xlu0 %1959 }
 0x282   : > { %v2206_v52 = vpop.permute.xlu1 %2205 }
 0x283   : > { %v2392_v58 = vsel %vm2377_vm0, %v2390_v57, %v2206_v52 }
 0x284   : > { %v2394_v8 = vsel %vm2380_vm1, %v2392_v58, %v2240_v29 }
 0x285   : > { %2407 = vst [vmem:[%s4710_s17 + $0x30] sm:$0xff] %v2394_v8 }
 0x286   : > { %v2338_v47 = vpop.permute.xlu1 %2337 }
 0x287   : > { %v2398_v28 = vsel %vm2377_vm0, %v2396_v20, %v2338_v47 }
 0x28a   : > { %v1892_v56 = vpop.permute.xlu1 %1891 }
 0x28b   : > { %v2376_v7 = vsel %vm1630_vm8, %v4688_v5, %v1892_v56 }
 0x28e   : > { %v2024_v61 = vpop.permute.xlu1 %2023 }
 0x28f   : > { %v2384_v30 = vsel %vm1630_vm8, %v4741_v19, %v2024_v61  ;;  %v1699_v19 = vadd.f32 %v1698_v14, %v1697_v0 }
 0x292   : > { %v1926_v45 = vpop.permute.xlu1 %1925 }
 0x293   : > { %v2379_v48 = vsel %vm2377_vm0, %v2376_v7, %v1926_v45 }
 0x294   : > { %v2382_v55 = vsel %vm2380_vm1, %v2379_v48, %v1960_v50 }
 0x295   : > { %2405 = vst [vmem:[%s4710_s17 + $0x20] sm:$0xff] %v2382_v55 }
 0x297   : > { %v2058_v6 = vpop.permute.xlu1 %2057 }
 0x298   : > { %v2386_v39 = vsel %vm2377_vm0, %v2384_v30, %v2058_v6 }
 0x299   : > { %v2388_v59 = vsel %vm2380_vm1, %v2386_v39, %v2092_v53 }
 0x29a   : > { %2406 = vst [vmem:[%s4710_s17 + $0x28] sm:$0xff] %v2388_v59 }
 0x29b   : > { %v2370_v5 = vpop.permute.xlu1 %2369 }
 0x29c   : > { %v2399_v23 = vsel %vm2380_vm1, %v4736_v26, %v2370_v5 }
 0x29d   : > { %2404 = vst [vmem:[%s4710_s17 + $0x18] sm:$0xff] %v2399_v23 }
 0x2ac   : > { %v1803_v34 = vpop.permute.xlu0 %1802 }
 0x2ad   : > { %v1805_v10 = vsel %vm1630_vm8, %v1699_v19, %v1803_v34 }
 0x2ae   : > { %1807 = vst.msk [vmem:[%s212_s20] sm:$0x1] %vm1806_vm2, %v1805_v10 }
 0x2b0   : > { %v2372_v26 = vpop.permute.xlu0 %2371 }
 0x2b1   : > { %v2400_v22 = vsel %vm2380_vm1, %v2398_v28, %v2372_v26 }
 0x2b2   : > { %2408 = vst [vmem:[%s4710_s17 + $0x38] sm:$0xff] %v2400_v22 }
 0x2b3 PF: > { %s14_s14 = sadd.s32 1, %s3042_s14   ;;  %s4880_s12 = smov %s3038_s13 }
 0x2b4   : > { %p11_p5 = scmp.ge.s32.totalorder %s14_s14, 4   ;;  %s4881_s13 = smov %s4883_s15 }
 0x2b6   :  { %13 = sbr.rel (!%p11_p5) target bundleno = 2 (0x2), region = 73 }

</bundles_post_ra>
